<compile_context>
chip_gen: v5e
topology: v5e:2x2
jax: 0.10.0
libtpu: 0.0.40
codegen_flags: <defaults>
</compile_context>

<pallas_src>
import jax
import jax.numpy as jnp
from jax.experimental import pallas as pl
from jax.experimental.pallas import tpu as pltpu


def _round_up(a, b):
    return ((a + b - 1) // b) * b


# --------------------------------------------------------------------------- #
# Pallas kernel: fused (input proj + CouplingFlow + relu Linear stack)         #
# --------------------------------------------------------------------------- #
def _make_kernel(num_hidden_layers, P_h, P_o):
    NHL = num_hidden_layers
    n_mlp_hidden = NHL - 1      # coupling-MLP hidden (H->H) tanh layers after the first
    n_lin = NHL - 1             # post-flow relu Linear(H, H) stack

    # static row indices into the packed (NV, P_v) f32 vector buffer
    i_b_in, i_mask, i_w0t, i_b0 = 0, 1, 2, 3
    i_bmlp = 4                                   # NHL-1 rows
    i_bps = i_bmlp + n_mlp_hidden
    i_bpsh = i_bps + 1
    i_wts = i_bpsh + 1
    i_wtsh = i_wts + 1
    i_blin = i_wtsh + 1                          # NHL-1 rows
    i_bfin = i_blin + n_lin

    # static slab indices into the stacked (n_sq, P_h, P_h) square-weight buffer
    k_w0 = 0
    k_mlp = 1
    k_ps = k_mlp + n_mlp_hidden
    k_psh = k_ps + 1
    k_lin = k_psh + 1

    def kernel(x_ref, t_ref, vec_ref, win_ref, sq_ref, wfin_ref, out_ref, z_out_ref):
        x = x_ref[...]                                  # (TM, 2*IC), compute dtype
        t = t_ref[...].astype(jnp.float32)              # (TM, 1), exact f32 time
        vecs = vec_ref[...]                             # (NV, P_v), f32
        row = lambda i: vecs[i:i + 1, :P_h]             # (1, P_h), static slice

        W_in = win_ref[...]                             # (2*IC, P_h), compute dtype
        W_fin = wfin_ref[...]                           # (P_h, P_o),  compute dtype
        cdt = W_in.dtype
        dot = lambda a, b: jnp.dot(a.astype(cdt), b, preferred_element_type=jnp.float32)

        # fused initial_flow / initial_control / emb
        z = dot(x, W_in) + row(i_b_in)                  # (TM, P_h), f32
        mask = row(i_mask)

        # hoist the single lane-broadcast of t (reused three times below)
        t_b = jnp.broadcast_to(t, (x.shape[0], P_h))    # (TM, P_h)

        # CouplingFlow(n_layers=1): ContinuousAffineCoupling with TimeTanh (concat-free)
        h = jnp.tanh(dot(z * mask, sq_ref[k_w0]) + t_b * row(i_w0t) + row(i_b0))
        for li in range(n_mlp_hidden):
            h = jnp.tanh(dot(h, sq_ref[k_mlp + li]) + row(i_bmlp + li))

        scale = dot(h, sq_ref[k_ps]) + row(i_bps)       # (TM, P_h)
        shift = dot(h, sq_ref[k_psh]) + row(i_bpsh)     # (TM, P_h)
        t_scale = jnp.tanh(row(i_wts) * t_b)            # TimeTanh
        t_shift = jnp.tanh(row(i_wtsh) * t_b)

        # z*mask recomputed here (one extra VPU mul) instead of keeping a zm live range
        y = z * mask + (1.0 - mask) * (z * jnp.exp(scale * t_scale) + shift * t_shift)

        zz = jnp.maximum(y, 0.0)                        # z.relu()
        for li in range(n_lin):
            zz = jnp.maximum(dot(zz, sq_ref[k_lin + li]) + row(i_blin + li), 0.0)
        out = dot(zz, W_fin) + vecs[i_bfin:i_bfin + 1, :P_o]

        out_ref[...] = out.astype(out_ref.dtype)
        z_out_ref[...] = zz.astype(z_out_ref.dtype)

    return kernel


# --------------------------------------------------------------------------- #
# Glue: torchcde.CubicSpline(coeffs, times).evaluate(times)                    #
# --------------------------------------------------------------------------- #
def cubic_spline_evaluate(coeffs, times):
    # coeffs: (B, L-1, 4*C) laid out [a | b | two_c | three_d] (torchcde natural cubic)
    Lm1 = coeffs.shape[-2]
    a, b, two_c, three_d = jnp.split(coeffs, 4, axis=-1)
    idx = jnp.clip(jnp.searchsorted(times, times, side="left") - 1, 0, Lm1 - 1)
    frac = (times - times[idx])[None, :, None]
    a_i, b_i = a[:, idx, :], b[:, idx, :]
    c_i, d_i = two_c[:, idx, :], three_d[:, idx, :]
    inner = 0.5 * c_i + d_i * frac / 3.0
    inner = b_i + inner * frac
    return a_i + inner * frac


# --------------------------------------------------------------------------- #
# Parameter preprocessing: fuse / split / zero-pad to lane-dense layout        #
# --------------------------------------------------------------------------- #
def prepare_params(params, input_channels, hidden_channels, num_hidden_layers,
                   output_channels):
    IC, H, NHL, OC = input_channels, hidden_channels, num_hidden_layers, output_channels
    P_h = _round_up(H, 128)               # lane-dense hidden width
    P_o = _round_up(OC, 128)              # lane-dense output width (decoupled from P_h)
    P_v = max(P_h, P_o)                   # packed-vector width

    it = iter(params)
    nxt = lambda: next(it)
    Wif, bif = nxt(), nxt()                       # initial_flow   (IC, H), (1, H)
    Wic, bic = nxt(), nxt()                       # initial_control
    Wemb, bemb = nxt(), nxt()                     # emb            (2H, H), (1, H)
    mask = nxt()                                  # coupling mask  (1, H)
    mlp = [(nxt(), nxt()) for _ in range(NHL)]    # coupling MLP
    Wp, bp = nxt(), nxt()                         # coupling out   (H, 2H), (1, 2H)
    wt = nxt()                                    # TimeTanh       (1, 2H)
    lins = [(nxt(), nxt()) for _ in range(NHL - 1)]
    Wfin, bfin = nxt(), nxt()                     # final          (H, OC), (1, OC)

    # fuse: emb(cat([xt@Wif+bif, sp@Wic+bic])) == [xt|sp] @ W_in + b_in
    Wemb_f, Wemb_c = Wemb[:H, :], Wemb[H:, :]
    W_in = jnp.concatenate([Wif @ Wemb_f, Wic @ Wemb_c], axis=0)          # (2*IC, H)
    b_in = bif @ Wemb_f + bic @ Wemb_c + bemb                             # (1, H)

    # split first coupling-MLP layer: rows 0..H-1 act on z*mask, row H acts on t
    W0, b0 = mlp[0]
    W0_h, w0_t = W0[:H, :], W0[H:H + 1, :]

    # split coupling output and TimeTanh into scale / shift halves
    Wp_s, Wp_sh = Wp[:, :H], Wp[:, H:]
    bp_s, bp_sh = bp[:, :H], bp[:, H:]
    wt_s, wt_sh = wt[:, :H], wt[:, H:]

    def pad2(W, rows, cols):
        Z = jnp.zeros((rows, cols), jnp.float32)
        return Z.at[:W.shape[0], :W.shape[1]].set(W.astype(jnp.float32))

    def padrow(v):
        Z = jnp.zeros((1, P_v), jnp.float32)
        return Z.at[:, :v.shape[1]].set(v.astype(jnp.float32))

    # NOTE: padded lanes of mask / biases / time weights and all weight pads must stay
    # exactly zero so padded lanes are 0 through the whole tanh/exp chain.
    W_in_p = pad2(W_in, 2 * IC, P_h)
    sq = [pad2(W0_h, P_h, P_h)]
    vecs = [padrow(b_in), padrow(mask), padrow(w0_t), padrow(b0)]
    for (W, b) in mlp[1:]:
        sq.append(pad2(W, P_h, P_h))
        vecs.append(padrow(b))
    sq += [pad2(Wp_s, P_h, P_h), pad2(Wp_sh, P_h, P_h)]
    vecs += [padrow(bp_s), padrow(bp_sh), padrow(wt_s), padrow(wt_sh)]
    for (W, b) in lins:
        sq.append(pad2(W, P_h, P_h))
        vecs.append(padrow(b))
    W_fin_p = pad2(Wfin, P_h, P_o)
    vecs.append(padrow(bfin))

    sq_stack = jnp.stack(sq, axis=0)              # (n_sq, P_h, P_h)
    vec_pack = jnp.concatenate(vecs, axis=0)      # (NV, P_v), stays f32
    return W_in_p, sq_stack, W_fin_p, vec_pack, P_h, P_o


# --------------------------------------------------------------------------- #
# Wrapper                                                                      #
# --------------------------------------------------------------------------- #
def neural_flow_forward(x, seq_ts, seq_mask, coeffs, times, params, *,
                        hidden_channels, num_hidden_layers, output_channels,
                        tile_m=512, compute_dtype=jnp.bfloat16):
    del seq_mask  # only used when input_option == 'n'
    B, L, _ = x.shape
    H, OC, NHL = hidden_channels, output_channels, num_hidden_layers

    xt = jnp.concatenate([seq_ts[..., None], x], axis=-1)   # (B, L, IC); col 0 is t
    sp = cubic_spline_evaluate(coeffs, times)                # (B, L, IC)
    IC = xt.shape[-1]
    IC2 = 2 * IC
    N = B * L

    # packed activation input [xt | sp] in compute dtype + exact f32 time side input
    packed = jnp.concatenate([xt, sp], axis=-1).reshape(N, IC2).astype(compute_dtype)
    t_col = seq_ts.reshape(N, 1).astype(jnp.float32)

    W_in, sq_stack, W_fin, vec_pack, P_h, P_o = prepare_params(params, IC, H, NHL, OC)
    W_in = W_in.astype(compute_dtype)
    sq_stack = sq_stack.astype(compute_dtype)
    W_fin = W_fin.astype(compute_dtype)
    # vec_pack stays f32: biases/mask/time weights are applied to the f32 accumulator.

    itemsize = jnp.dtype(compute_dtype).itemsize
    sub = 16 if itemsize < 4 else 8                          # packed-sublane multiple

    # tile sizing + remainder handling (pad N up to a tile multiple, slice back after)
    tm = max(sub, min(int(tile_m), _round_up(N, sub)))
    tm = _round_up(tm, sub)
    # for small N, make sure the grid has >= 2 steps so both v7x TensorCores get work
    if N > 2 * sub and (_round_up(N, tm) // tm) < 2:
        tm = _round_up(-(-N // 2), sub)
    N_pad = _round_up(N, tm)
    if N_pad != N:
        packed = jnp.pad(packed, ((0, N_pad - N), (0, 0)))
        t_col = jnp.pad(t_col, ((0, N_pad - N), (0, 0)))

    kernel = _make_kernel(NHL, P_h, P_o)

    # explicit VMEM budget: weights (worst-case double-buffered) + pipelined I/O tiles
    # + live (tm, P_h) f32 intermediates, capped under the chip's physical VMEM.
    weight_bytes = (W_in.size + sq_stack.size + W_fin.size) * itemsize + vec_pack.size * 4
    io_bytes = 2 * (tm * IC2 * itemsize + tm * 4) + 2 * 2 * tm * (P_h + P_o) * itemsize
    live_bytes = 12 * tm * P_h * 4
    est = 2 * weight_bytes + io_bytes + live_bytes + (8 << 20)
    try:
        vmem_cap = int(pltpu.get_tpu_info().vmem_capacity_bytes)
    except Exception:
        vmem_cap = 64 << 20                                  # v7x-safe fallback
    vmem_limit = int(min(max(est, 32 << 20), int(vmem_cap * 0.9)))

    def build(weight_mode, vmem_bytes):
        def const_spec(shape):
            nd = len(shape)
            if weight_mode is None:
                return pl.BlockSpec(shape, lambda i, nd=nd: (0,) * nd)
            return pl.BlockSpec(shape, lambda i, nd=nd: (0,) * nd,
                                pipeline_mode=weight_mode)

        in_specs = [
            pl.BlockSpec((tm, IC2), lambda i: (i, 0)),       # packed [xt | sp]
            pl.BlockSpec((tm, 1), lambda i: (i, 0)),         # exact f32 time column
            const_spec(vec_pack.shape),                      # packed bias/mask/time rows
            const_spec(W_in.shape),                          # fused input projection
            const_spec(sq_stack.shape),                      # stacked (P_h,P_h) weights
            const_spec(W_fin.shape),                         # final (P_h,P_o) weight
        ]
        out_specs = [
            pl.BlockSpec((tm, P_o), lambda i: (i, 0)),
            pl.BlockSpec((tm, P_h), lambda i: (i, 0)),
        ]
        out_shape = (jax.ShapeDtypeStruct((N_pad, P_o), compute_dtype),
                     jax.ShapeDtypeStruct((N_pad, P_h), compute_dtype))
        cp = dict(dimension_semantics=("parallel",))
        if vmem_bytes is not None:
            cp["vmem_limit_bytes"] = vmem_bytes
        return pl.pallas_call(
            kernel,
            grid=(N_pad // tm,),
            in_specs=in_specs,
            out_specs=out_specs,
            out_shape=out_shape,
            compiler_params=pltpu.CompilerParams(**cp),
        )

    args = (packed, t_col, vec_pack, W_in, sq_stack, W_fin)
    try:
        # single-buffer the grid-invariant weights (constant index_map -> no prefetch)
        out_p, z_p = build(pl.Buffered(1), vmem_limit)(*args)
    except Exception:
        # fallback: default double-buffering / default VMEM limit (always runnable)
        out_p, z_p = build(None, None)(*args)

    out = out_p[:N, :OC].reshape(B, L, OC)
    z = z_p[:N, :H].reshape(B, L, H)
    return out, z


# --------------------------------------------------------------------------- #
# Deterministic parameter construction (shapes follow the module __init__)     #
# --------------------------------------------------------------------------- #
def init_params(key, input_channels, hidden_channels, num_hidden_layers, output_channels):
    H, IC, OC = hidden_channels, input_channels, output_channels
    keys = iter(jax.random.split(key, 64))

    def linear(in_dim, out_dim):
        k1, k2 = next(keys), next(keys)
        bound = 1.0 / float(in_dim) ** 0.5
        W = jax.random.uniform(k1, (in_dim, out_dim), jnp.float32, -bound, bound)
        b = jax.random.uniform(k2, (1, out_dim), jnp.float32, -bound, bound)
        return W, b

    params = []
    params += list(linear(IC, H))                    # initial_flow
    params += list(linear(IC, H))                    # initial_control
    params += list(linear(2 * H, H))                 # emb
    mask = jnp.zeros((1, H), jnp.float32).at[:, : H // 2].set(1.0)  # ordered_0 mask
    params.append(mask)
    params += list(linear(H + 1, H))                 # coupling MLP layer 0
    for _ in range(num_hidden_layers - 1):
        params += list(linear(H, H))                 # coupling MLP hidden layers
    params += list(linear(H, 2 * H))                 # coupling MLP out -> scale/shift
    params.append(jax.random.normal(next(keys), (1, 2 * H), jnp.float32) * 0.1)  # TimeTanh w
    for _ in range(num_hidden_layers - 1):
        params += list(linear(H, H))                 # self.linears
    params += list(linear(H, OC))                    # self.linear
    return params


# --------------------------------------------------------------------------- #
# Pure-JAX reference (un-fused, un-padded f32 math) for verification           #
# --------------------------------------------------------------------------- #
def reference_forward(xt2, sp2, t2, params, H, num_hidden_layers):
    it = iter(params)
    nxt = lambda: next(it)
    Wif, bif = nxt(), nxt(); Wic, bic = nxt(), nxt(); Wemb, bemb = nxt(), nxt()
    mask = nxt()
    mlp = [(nxt(), nxt()) for _ in range(num_hidden_layers)]
    Wp, bp = nxt(), nxt(); wt = nxt()
    lins = [(nxt(), nxt()) for _ in range(num_hidden_layers - 1)]
    Wfin, bfin = nxt(), nxt()

    z_flow = xt2 @ Wif + bif
    z_x = sp2 @ Wic + bic
    z = jnp.concatenate([z_flow, z_x], -1) @ Wemb + bemb
    h = jnp.concatenate([z * mask, t2], -1)
    for W, b in mlp:
        h = jnp.tanh(h @ W + b)
    p = h @ Wp + bp
    scale, shift = p[:, :H], p[:, H:]
    tnet = jnp.tanh(wt * t2)
    ts_, tsh = tnet[:, :H], tnet[:, H:]
    y = z * mask + (1.0 - mask) * (z * jnp.exp(scale * ts_) + shift * tsh)
    zz = jnp.maximum(y, 0.0)
    for W, b in lins:
        zz = jnp.maximum(zz @ W + b, 0.0)
    out = zz @ Wfin + bfin
    return out, zz


if __name__ == "__main__":
    B, L, F = 2, 8, 4            # batch, seq_len, raw features
    IC = F + 1                   # input_channels = [time, features]
    H, NHL, OC = 32, 2, 4        # hidden_channels, num_hidden_layers, output_channels

    key = jax.random.PRNGKey(0)
    kx, kc, kp = jax.random.split(key, 3)

    times = jnp.linspace(0.0, 1.0, L).astype(jnp.float32)          # (L,)
    seq_ts = jnp.tile(times[None, :], (B, 1))                      # (B, L)
    x = jax.random.normal(kx, (B, L, F), jnp.float32)              # (B, L, F)
    seq_mask = jnp.ones((B, L), jnp.float32)                       # unused for 'z'
    coeffs = jax.random.normal(kc, (B, L - 1, 4 * IC), jnp.float32)  # spline coeffs

    params = init_params(kp, IC, H, NHL, OC)

    out, z = neural_flow_forward(x, seq_ts, seq_mask, coeffs, times, params,
                                 hidden_channels=H, num_hidden_layers=NHL,
                                 output_channels=OC)
    out = jax.block_until_ready(out)
    z = jax.block_until_ready(z)

    # verify against plain-JAX f32 reference (un-fused math on the raw params)
    xt2 = jnp.concatenate([seq_ts[..., None], x], -1).reshape(B * L, IC)
    sp2 = cubic_spline_evaluate(coeffs, times).reshape(B * L, IC)
    t2 = seq_ts.reshape(B * L, 1)
    ref_out, ref_z = reference_forward(xt2, sp2, t2, params, H, NHL)

    assert out.shape == (B, L, OC) and z.shape == (B, L, H)
    out_f = out.astype(jnp.float32).reshape(B * L, OC)
    z_f = z.astype(jnp.float32).reshape(B * L, H)
    # bf16 MXU path + bf16 output store -> relaxed tolerance vs the f32 reference
    assert jnp.allclose(out_f, ref_out, atol=8e-2, rtol=8e-2), \
        float(jnp.max(jnp.abs(out_f - ref_out)))
    assert jnp.allclose(z_f, ref_z, atol=8e-2, rtol=8e-2), \
        float(jnp.max(jnp.abs(z_f - ref_z)))

    print("KERNEL_OK")
</pallas_src>

<mosaic_0001>
module attributes {stable_mosaic.version = 11 : i64} {
  func.func @kernel(%arg0: i32, %arg1: memref<16x10xbf16, #tpu.memory_space<vmem>>, %arg2: memref<16x1xf32, #tpu.memory_space<vmem>>, %arg3: memref<11x128xf32, #tpu.memory_space<vmem>>, %arg4: memref<10x128xbf16, #tpu.memory_space<vmem>>, %arg5: memref<5x128x128xbf16, #tpu.memory_space<vmem>>, %arg6: memref<128x128xbf16, #tpu.memory_space<vmem>>, %arg7: memref<16x128xbf16, #tpu.memory_space<vmem>>, %arg8: memref<16x128xbf16, #tpu.memory_space<vmem>>) attributes {dimension_semantics = [#tpu.dimension_semantics<parallel>], iteration_bounds = array<i64: 1>, scalar_prefetch = 0 : i64, scratch_operands = 0 : i64, tpu.core_type = #tpu.core_type<tc>, window_params = [{transform_indices = @transform_0, window_bounds = array<i64: 16, 10>}, {transform_indices = @transform_1, window_bounds = array<i64: 16, 1>}, {pipeline_mode = #tpu.pipeline_mode<synchronous>, transform_indices = @transform_2, window_bounds = array<i64: 11, 128>}, {pipeline_mode = #tpu.pipeline_mode<synchronous>, transform_indices = @transform_3, window_bounds = array<i64: 10, 128>}, {pipeline_mode = #tpu.pipeline_mode<synchronous>, transform_indices = @transform_4, window_bounds = array<i64: 5, 128, 128>}, {pipeline_mode = #tpu.pipeline_mode<synchronous>, transform_indices = @transform_5, window_bounds = array<i64: 128, 128>}, {transform_indices = @transform_6, window_bounds = array<i64: 16, 128>}, {transform_indices = @transform_7, window_bounds = array<i64: 16, 128>}]} {
    %c0 = arith.constant 0 : index
    %c0_0 = arith.constant 0 : index
    %0 = vector.load %arg1[%c0, %c0_0] : memref<16x10xbf16, #tpu.memory_space<vmem>>, vector<16x10xbf16>
    %c0_1 = arith.constant 0 : index
    %c0_2 = arith.constant 0 : index
    %1 = vector.load %arg2[%c0_1, %c0_2] : memref<16x1xf32, #tpu.memory_space<vmem>>, vector<16x1xf32>
    %c0_3 = arith.constant 0 : index
    %c0_4 = arith.constant 0 : index
    %2 = vector.load %arg3[%c0_3, %c0_4] : memref<11x128xf32, #tpu.memory_space<vmem>>, vector<11x128xf32>
    %c0_5 = arith.constant 0 : index
    %c0_6 = arith.constant 0 : index
    %3 = vector.load %arg4[%c0_5, %c0_6] : memref<10x128xbf16, #tpu.memory_space<vmem>>, vector<10x128xbf16>
    %c0_7 = arith.constant 0 : index
    %c0_8 = arith.constant 0 : index
    %4 = vector.load %arg6[%c0_7, %c0_8] : memref<128x128xbf16, #tpu.memory_space<vmem>>, vector<128x128xbf16>
    %cst = arith.constant dense<0.000000e+00> : vector<16x128xf32>
    %5 = tpu.matmul %0, %3, %cst {dimension_numbers = #tpu.dot_dimension_numbers<[1], [0], [0], [1], [0, 0, 1, 1], [], []>} : vector<16x10xbf16>, vector<10x128xbf16>, vector<16x128xf32> -> vector<16x128xf32>
    %6 = vector.extract_strided_slice %2 {offsets = [0, 0], sizes = [1, 128], strides = [1, 1]} : vector<11x128xf32> to vector<1x128xf32>
    %7 = vector.broadcast %6 : vector<1x128xf32> to vector<16x128xf32>
    %8 = arith.addf %5, %7 : vector<16x128xf32>
    %9 = vector.extract_strided_slice %2 {offsets = [1, 0], sizes = [1, 128], strides = [1, 1]} : vector<11x128xf32> to vector<1x128xf32>
    %10 = vector.shape_cast %1 : vector<16x1xf32> to vector<16x1xf32>
    %11 = vector.broadcast %10 : vector<16x1xf32> to vector<16x128xf32>
    %12 = vector.broadcast %9 : vector<1x128xf32> to vector<16x128xf32>
    %13 = arith.mulf %8, %12 : vector<16x128xf32>
    %c0_9 = arith.constant 0 : index
    %c0_10 = arith.constant 0 : index
    %c0_11 = arith.constant 0 : index
    %14 = vector.load %arg5[%c0_9, %c0_10, %c0_11] : memref<5x128x128xbf16, #tpu.memory_space<vmem>>, vector<1x128x128xbf16>
    %15 = vector.shape_cast %14 : vector<1x128x128xbf16> to vector<128x128xbf16>
    %16 = arith.truncf %13 : vector<16x128xf32> to vector<16x128xbf16>
    %cst_12 = arith.constant dense<0.000000e+00> : vector<16x128xf32>
    %17 = tpu.matmul %16, %15, %cst_12 {dimension_numbers = #tpu.dot_dimension_numbers<[1], [0], [0], [1], [0, 0, 1, 1], [], []>} : vector<16x128xbf16>, vector<128x128xbf16>, vector<16x128xf32> -> vector<16x128xf32>
    %18 = vector.extract_strided_slice %2 {offsets = [2, 0], sizes = [1, 128], strides = [1, 1]} : vector<11x128xf32> to vector<1x128xf32>
    %19 = vector.broadcast %18 : vector<1x128xf32> to vector<16x128xf32>
    %20 = arith.mulf %11, %19 : vector<16x128xf32>
    %21 = arith.addf %17, %20 : vector<16x128xf32>
    %22 = vector.extract_strided_slice %2 {offsets = [3, 0], sizes = [1, 128], strides = [1, 1]} : vector<11x128xf32> to vector<1x128xf32>
    %23 = vector.broadcast %22 : vector<1x128xf32> to vector<16x128xf32>
    %24 = arith.addf %21, %23 : vector<16x128xf32>
    %25 = math.tanh %24 : vector<16x128xf32>
    %c1 = arith.constant 1 : index
    %c0_13 = arith.constant 0 : index
    %c0_14 = arith.constant 0 : index
    %26 = vector.load %arg5[%c1, %c0_13, %c0_14] : memref<5x128x128xbf16, #tpu.memory_space<vmem>>, vector<1x128x128xbf16>
    %27 = vector.shape_cast %26 : vector<1x128x128xbf16> to vector<128x128xbf16>
    %28 = arith.truncf %25 : vector<16x128xf32> to vector<16x128xbf16>
    %cst_15 = arith.constant dense<0.000000e+00> : vector<16x128xf32>
    %29 = tpu.matmul %28, %27, %cst_15 {dimension_numbers = #tpu.dot_dimension_numbers<[1], [0], [0], [1], [0, 0, 1, 1], [], []>} : vector<16x128xbf16>, vector<128x128xbf16>, vector<16x128xf32> -> vector<16x128xf32>
    %30 = vector.extract_strided_slice %2 {offsets = [4, 0], sizes = [1, 128], strides = [1, 1]} : vector<11x128xf32> to vector<1x128xf32>
    %31 = vector.broadcast %30 : vector<1x128xf32> to vector<16x128xf32>
    %32 = arith.addf %29, %31 : vector<16x128xf32>
    %33 = math.tanh %32 : vector<16x128xf32>
    %c2 = arith.constant 2 : index
    %c0_16 = arith.constant 0 : index
    %c0_17 = arith.constant 0 : index
    %34 = vector.load %arg5[%c2, %c0_16, %c0_17] : memref<5x128x128xbf16, #tpu.memory_space<vmem>>, vector<1x128x128xbf16>
    %35 = vector.shape_cast %34 : vector<1x128x128xbf16> to vector<128x128xbf16>
    %36 = arith.truncf %33 : vector<16x128xf32> to vector<16x128xbf16>
    %cst_18 = arith.constant dense<0.000000e+00> : vector<16x128xf32>
    %37 = tpu.matmul %36, %35, %cst_18 {dimension_numbers = #tpu.dot_dimension_numbers<[1], [0], [0], [1], [0, 0, 1, 1], [], []>} : vector<16x128xbf16>, vector<128x128xbf16>, vector<16x128xf32> -> vector<16x128xf32>
    %38 = vector.extract_strided_slice %2 {offsets = [5, 0], sizes = [1, 128], strides = [1, 1]} : vector<11x128xf32> to vector<1x128xf32>
    %39 = vector.broadcast %38 : vector<1x128xf32> to vector<16x128xf32>
    %40 = arith.addf %37, %39 : vector<16x128xf32>
    %c3 = arith.constant 3 : index
    %c0_19 = arith.constant 0 : index
    %c0_20 = arith.constant 0 : index
    %41 = vector.load %arg5[%c3, %c0_19, %c0_20] : memref<5x128x128xbf16, #tpu.memory_space<vmem>>, vector<1x128x128xbf16>
    %42 = vector.shape_cast %41 : vector<1x128x128xbf16> to vector<128x128xbf16>
    %43 = arith.truncf %33 : vector<16x128xf32> to vector<16x128xbf16>
    %cst_21 = arith.constant dense<0.000000e+00> : vector<16x128xf32>
    %44 = tpu.matmul %43, %42, %cst_21 {dimension_numbers = #tpu.dot_dimension_numbers<[1], [0], [0], [1], [0, 0, 1, 1], [], []>} : vector<16x128xbf16>, vector<128x128xbf16>, vector<16x128xf32> -> vector<16x128xf32>
    %45 = vector.extract_strided_slice %2 {offsets = [6, 0], sizes = [1, 128], strides = [1, 1]} : vector<11x128xf32> to vector<1x128xf32>
    %46 = vector.broadcast %45 : vector<1x128xf32> to vector<16x128xf32>
    %47 = arith.addf %44, %46 : vector<16x128xf32>
    %48 = vector.extract_strided_slice %2 {offsets = [7, 0], sizes = [1, 128], strides = [1, 1]} : vector<11x128xf32> to vector<1x128xf32>
    %49 = vector.broadcast %48 : vector<1x128xf32> to vector<16x128xf32>
    %50 = arith.mulf %49, %11 : vector<16x128xf32>
    %51 = math.tanh %50 : vector<16x128xf32>
    %52 = vector.extract_strided_slice %2 {offsets = [8, 0], sizes = [1, 128], strides = [1, 1]} : vector<11x128xf32> to vector<1x128xf32>
    %53 = vector.broadcast %52 : vector<1x128xf32> to vector<16x128xf32>
    %54 = arith.mulf %53, %11 : vector<16x128xf32>
    %55 = math.tanh %54 : vector<16x128xf32>
    %56 = vector.broadcast %9 : vector<1x128xf32> to vector<16x128xf32>
    %57 = arith.mulf %8, %56 : vector<16x128xf32>
    %cst_22 = arith.constant 1.000000e+00 : f32
    %58 = vector.broadcast %cst_22 : f32 to vector<1x128xf32>
    %59 = arith.subf %58, %9 : vector<1x128xf32>
    %60 = arith.mulf %40, %51 : vector<16x128xf32>
    %61 = math.exp %60 : vector<16x128xf32>
    %62 = arith.mulf %8, %61 : vector<16x128xf32>
    %63 = arith.mulf %47, %55 : vector<16x128xf32>
    %64 = arith.addf %62, %63 : vector<16x128xf32>
    %65 = vector.broadcast %59 : vector<1x128xf32> to vector<16x128xf32>
    %66 = arith.mulf %65, %64 : vector<16x128xf32>
    %67 = arith.addf %57, %66 : vector<16x128xf32>
    %cst_23 = arith.constant 0.000000e+00 : f32
    %68 = vector.broadcast %cst_23 : f32 to vector<16x128xf32>
    %69 = arith.maximumf %67, %68 : vector<16x128xf32>
    %c4 = arith.constant 4 : index
    %c0_24 = arith.constant 0 : index
    %c0_25 = arith.constant 0 : index
    %70 = vector.load %arg5[%c4, %c0_24, %c0_25] : memref<5x128x128xbf16, #tpu.memory_space<vmem>>, vector<1x128x128xbf16>
    %71 = vector.shape_cast %70 : vector<1x128x128xbf16> to vector<128x128xbf16>
    %72 = arith.truncf %69 : vector<16x128xf32> to vector<16x128xbf16>
    %cst_26 = arith.constant dense<0.000000e+00> : vector<16x128xf32>
    %73 = tpu.matmul %72, %71, %cst_26 {dimension_numbers = #tpu.dot_dimension_numbers<[1], [0], [0], [1], [0, 0, 1, 1], [], []>} : vector<16x128xbf16>, vector<128x128xbf16>, vector<16x128xf32> -> vector<16x128xf32>
    %74 = vector.extract_strided_slice %2 {offsets = [9, 0], sizes = [1, 128], strides = [1, 1]} : vector<11x128xf32> to vector<1x128xf32>
    %75 = vector.broadcast %74 : vector<1x128xf32> to vector<16x128xf32>
    %76 = arith.addf %73, %75 : vector<16x128xf32>
    %cst_27 = arith.constant 0.000000e+00 : f32
    %77 = vector.broadcast %cst_27 : f32 to vector<16x128xf32>
    %78 = arith.maximumf %76, %77 : vector<16x128xf32>
    %79 = arith.truncf %78 : vector<16x128xf32> to vector<16x128xbf16>
    %cst_28 = arith.constant dense<0.000000e+00> : vector<16x128xf32>
    %80 = tpu.matmul %79, %4, %cst_28 {dimension_numbers = #tpu.dot_dimension_numbers<[1], [0], [0], [1], [0, 0, 1, 1], [], []>} : vector<16x128xbf16>, vector<128x128xbf16>, vector<16x128xf32> -> vector<16x128xf32>
    %81 = vector.extract_strided_slice %2 {offsets = [10, 0], sizes = [1, 128], strides = [1, 1]} : vector<11x128xf32> to vector<1x128xf32>
    %82 = vector.broadcast %81 : vector<1x128xf32> to vector<16x128xf32>
    %83 = arith.addf %80, %82 : vector<16x128xf32>
    %84 = arith.truncf %83 : vector<16x128xf32> to vector<16x128xbf16>
    %c0_29 = arith.constant 0 : index
    %c0_30 = arith.constant 0 : index
    %85 = vector.load %arg7[%c0_29, %c0_30] : memref<16x128xbf16, #tpu.memory_space<vmem>>, vector<16x128xbf16>
    tpu.vector_store %arg7[%c0_29, %c0_30], %84 {strides = array<i32>} : memref<16x128xbf16, #tpu.memory_space<vmem>>, vector<16x128xbf16>,
    %86 = arith.truncf %78 : vector<16x128xf32> to vector<16x128xbf16>
    %c0_31 = arith.constant 0 : index
    %c0_32 = arith.constant 0 : index
    %87 = vector.load %arg8[%c0_31, %c0_32] : memref<16x128xbf16, #tpu.memory_space<vmem>>, vector<16x128xbf16>
    tpu.vector_store %arg8[%c0_31, %c0_32], %86 {strides = array<i32>} : memref<16x128xbf16, #tpu.memory_space<vmem>>, vector<16x128xbf16>,
    return
  }
  func.func @transform_0(%arg0: i32) -> (i32, i32) {
    %c0_i32 = arith.constant 0 : i32
    %c0_i32_0 = arith.constant 0 : i32
    return %arg0, %c0_i32 : i32, i32
  }
  func.func @transform_1(%arg0: i32) -> (i32, i32) {
    %c0_i32 = arith.constant 0 : i32
    %c0_i32_0 = arith.constant 0 : i32
    return %arg0, %c0_i32 : i32, i32
  }
  func.func @transform_2(%arg0: i32) -> (i32, i32) {
    %c0_i32 = arith.constant 0 : i32
    %c0_i32_0 = arith.constant 0 : i32
    %c0_i32_1 = arith.constant 0 : i32
    return %c0_i32, %c0_i32_0 : i32, i32
  }
  func.func @transform_3(%arg0: i32) -> (i32, i32) {
    %c0_i32 = arith.constant 0 : i32
    %c0_i32_0 = arith.constant 0 : i32
    %c0_i32_1 = arith.constant 0 : i32
    return %c0_i32, %c0_i32_0 : i32, i32
  }
  func.func @transform_4(%arg0: i32) -> (i32, i32, i32) {
    %c0_i32 = arith.constant 0 : i32
    %c0_i32_0 = arith.constant 0 : i32
    %c0_i32_1 = arith.constant 0 : i32
    %c0_i32_2 = arith.constant 0 : i32
    return %c0_i32, %c0_i32_0, %c0_i32_1 : i32, i32, i32
  }
  func.func @transform_5(%arg0: i32) -> (i32, i32) {
    %c0_i32 = arith.constant 0 : i32
    %c0_i32_0 = arith.constant 0 : i32
    %c0_i32_1 = arith.constant 0 : i32
    return %c0_i32, %c0_i32_0 : i32, i32
  }
  func.func @transform_6(%arg0: i32) -> (i32, i32) {
    %c0_i32 = arith.constant 0 : i32
    %c0_i32_0 = arith.constant 0 : i32
    return %arg0, %c0_i32 : i32, i32
  }
  func.func @transform_7(%arg0: i32) -> (i32, i32) {
    %c0_i32 = arith.constant 0 : i32
    %c0_i32_0 = arith.constant 0 : i32
    return %arg0, %c0_i32 : i32, i32
  }
}

module attributes {stable_mosaic.version = 11 : i64} {
  func.func @kernel(%arg0: i32, %arg1: memref<16x10xbf16, #tpu.memory_space<vmem>>, %arg2: memref<16x1xf32, #tpu.memory_space<vmem>>, %arg3: memref<11x128xf32, #tpu.memory_space<vmem>>, %arg4: memref<10x128xbf16, #tpu.memory_space<vmem>>, %arg5: memref<5x128x128xbf16, #tpu.memory_space<vmem>>, %arg6: memref<128x128xbf16, #tpu.memory_space<vmem>>, %arg7: memref<16x128xbf16, #tpu.memory_space<vmem>>, %arg8: memref<16x128xbf16, #tpu.memory_space<vmem>>) attributes {dimension_semantics = [#tpu.dimension_semantics<parallel>], iteration_bounds = array<i64: 1>, scalar_prefetch = 0 : i64, scratch_operands = 0 : i64, tpu.core_type = #tpu.core_type<tc>, window_params = [{transform_indices = @transform_0, window_bounds = array<i64: 16, 10>}, {transform_indices = @transform_1, window_bounds = array<i64: 16, 1>}, {pipeline_mode = #tpu.pipeline_mode<synchronous>, transform_indices = @transform_2, window_bounds = array<i64: 11, 128>}, {pipeline_mode = #tpu.pipeline_mode<synchronous>, transform_indices = @transform_3, window_bounds = array<i64: 10, 128>}, {pipeline_mode = #tpu.pipeline_mode<synchronous>, transform_indices = @transform_4, window_bounds = array<i64: 5, 128, 128>}, {pipeline_mode = #tpu.pipeline_mode<synchronous>, transform_indices = @transform_5, window_bounds = array<i64: 128, 128>}, {transform_indices = @transform_6, window_bounds = array<i64: 16, 128>}, {transform_indices = @transform_7, window_bounds = array<i64: 16, 128>}]} {
    %c0 = arith.constant 0 : index
    %c0_0 = arith.constant 0 : index
    %0 = vector.load %arg1[%c0, %c0_0] : memref<16x10xbf16, #tpu.memory_space<vmem>>, vector<16x10xbf16>
    %c0_1 = arith.constant 0 : index
    %c0_2 = arith.constant 0 : index
    %1 = vector.load %arg2[%c0_1, %c0_2] : memref<16x1xf32, #tpu.memory_space<vmem>>, vector<16x1xf32>
    %c0_3 = arith.constant 0 : index
    %c0_4 = arith.constant 0 : index
    %2 = vector.load %arg3[%c0_3, %c0_4] : memref<11x128xf32, #tpu.memory_space<vmem>>, vector<11x128xf32>
    %c0_5 = arith.constant 0 : index
    %c0_6 = arith.constant 0 : index
    %3 = vector.load %arg4[%c0_5, %c0_6] : memref<10x128xbf16, #tpu.memory_space<vmem>>, vector<10x128xbf16>
    %c0_7 = arith.constant 0 : index
    %c0_8 = arith.constant 0 : index
    %4 = vector.load %arg6[%c0_7, %c0_8] : memref<128x128xbf16, #tpu.memory_space<vmem>>, vector<128x128xbf16>
    %cst = arith.constant dense<0.000000e+00> : vector<16x128xf32>
    %5 = tpu.matmul %0, %3, %cst {dimension_numbers = #tpu.dot_dimension_numbers<[1], [0], [0], [1], [0, 0, 1, 1], [], []>} : vector<16x10xbf16>, vector<10x128xbf16>, vector<16x128xf32> -> vector<16x128xf32>
    %6 = vector.extract_strided_slice %2 {offsets = [0, 0], sizes = [1, 128], strides = [1, 1]} : vector<11x128xf32> to vector<1x128xf32>
    %7 = vector.broadcast %6 : vector<1x128xf32> to vector<16x128xf32>
    %8 = arith.addf %5, %7 : vector<16x128xf32>
    %9 = vector.extract_strided_slice %2 {offsets = [1, 0], sizes = [1, 128], strides = [1, 1]} : vector<11x128xf32> to vector<1x128xf32>
    %10 = vector.shape_cast %1 : vector<16x1xf32> to vector<16x1xf32>
    %11 = vector.broadcast %10 : vector<16x1xf32> to vector<16x128xf32>
    %12 = vector.broadcast %9 : vector<1x128xf32> to vector<16x128xf32>
    %13 = arith.mulf %8, %12 : vector<16x128xf32>
    %c0_9 = arith.constant 0 : index
    %c0_10 = arith.constant 0 : index
    %c0_11 = arith.constant 0 : index
    %14 = vector.load %arg5[%c0_9, %c0_10, %c0_11] : memref<5x128x128xbf16, #tpu.memory_space<vmem>>, vector<1x128x128xbf16>
    %15 = vector.shape_cast %14 : vector<1x128x128xbf16> to vector<128x128xbf16>
    %16 = arith.truncf %13 : vector<16x128xf32> to vector<16x128xbf16>
    %cst_12 = arith.constant dense<0.000000e+00> : vector<16x128xf32>
    %17 = tpu.matmul %16, %15, %cst_12 {dimension_numbers = #tpu.dot_dimension_numbers<[1], [0], [0], [1], [0, 0, 1, 1], [], []>} : vector<16x128xbf16>, vector<128x128xbf16>, vector<16x128xf32> -> vector<16x128xf32>
    %18 = vector.extract_strided_slice %2 {offsets = [2, 0], sizes = [1, 128], strides = [1, 1]} : vector<11x128xf32> to vector<1x128xf32>
    %19 = vector.broadcast %18 : vector<1x128xf32> to vector<16x128xf32>
    %20 = arith.mulf %11, %19 : vector<16x128xf32>
    %21 = arith.addf %17, %20 : vector<16x128xf32>
    %22 = vector.extract_strided_slice %2 {offsets = [3, 0], sizes = [1, 128], strides = [1, 1]} : vector<11x128xf32> to vector<1x128xf32>
    %23 = vector.broadcast %22 : vector<1x128xf32> to vector<16x128xf32>
    %24 = arith.addf %21, %23 : vector<16x128xf32>
    %25 = math.tanh %24 : vector<16x128xf32>
    %c1 = arith.constant 1 : index
    %c0_13 = arith.constant 0 : index
    %c0_14 = arith.constant 0 : index
    %26 = vector.load %arg5[%c1, %c0_13, %c0_14] : memref<5x128x128xbf16, #tpu.memory_space<vmem>>, vector<1x128x128xbf16>
    %27 = vector.shape_cast %26 : vector<1x128x128xbf16> to vector<128x128xbf16>
    %28 = arith.truncf %25 : vector<16x128xf32> to vector<16x128xbf16>
    %cst_15 = arith.constant dense<0.000000e+00> : vector<16x128xf32>
    %29 = tpu.matmul %28, %27, %cst_15 {dimension_numbers = #tpu.dot_dimension_numbers<[1], [0], [0], [1], [0, 0, 1, 1], [], []>} : vector<16x128xbf16>, vector<128x128xbf16>, vector<16x128xf32> -> vector<16x128xf32>
    %30 = vector.extract_strided_slice %2 {offsets = [4, 0], sizes = [1, 128], strides = [1, 1]} : vector<11x128xf32> to vector<1x128xf32>
    %31 = vector.broadcast %30 : vector<1x128xf32> to vector<16x128xf32>
    %32 = arith.addf %29, %31 : vector<16x128xf32>
    %33 = math.tanh %32 : vector<16x128xf32>
    %c2 = arith.constant 2 : index
    %c0_16 = arith.constant 0 : index
    %c0_17 = arith.constant 0 : index
    %34 = vector.load %arg5[%c2, %c0_16, %c0_17] : memref<5x128x128xbf16, #tpu.memory_space<vmem>>, vector<1x128x128xbf16>
    %35 = vector.shape_cast %34 : vector<1x128x128xbf16> to vector<128x128xbf16>
    %36 = arith.truncf %33 : vector<16x128xf32> to vector<16x128xbf16>
    %cst_18 = arith.constant dense<0.000000e+00> : vector<16x128xf32>
    %37 = tpu.matmul %36, %35, %cst_18 {dimension_numbers = #tpu.dot_dimension_numbers<[1], [0], [0], [1], [0, 0, 1, 1], [], []>} : vector<16x128xbf16>, vector<128x128xbf16>, vector<16x128xf32> -> vector<16x128xf32>
    %38 = vector.extract_strided_slice %2 {offsets = [5, 0], sizes = [1, 128], strides = [1, 1]} : vector<11x128xf32> to vector<1x128xf32>
    %39 = vector.broadcast %38 : vector<1x128xf32> to vector<16x128xf32>
    %40 = arith.addf %37, %39 : vector<16x128xf32>
    %c3 = arith.constant 3 : index
    %c0_19 = arith.constant 0 : index
    %c0_20 = arith.constant 0 : index
    %41 = vector.load %arg5[%c3, %c0_19, %c0_20] : memref<5x128x128xbf16, #tpu.memory_space<vmem>>, vector<1x128x128xbf16>
    %42 = vector.shape_cast %41 : vector<1x128x128xbf16> to vector<128x128xbf16>
    %43 = arith.truncf %33 : vector<16x128xf32> to vector<16x128xbf16>
    %cst_21 = arith.constant dense<0.000000e+00> : vector<16x128xf32>
    %44 = tpu.matmul %43, %42, %cst_21 {dimension_numbers = #tpu.dot_dimension_numbers<[1], [0], [0], [1], [0, 0, 1, 1], [], []>} : vector<16x128xbf16>, vector<128x128xbf16>, vector<16x128xf32> -> vector<16x128xf32>
    %45 = vector.extract_strided_slice %2 {offsets = [6, 0], sizes = [1, 128], strides = [1, 1]} : vector<11x128xf32> to vector<1x128xf32>
    %46 = vector.broadcast %45 : vector<1x128xf32> to vector<16x128xf32>
    %47 = arith.addf %44, %46 : vector<16x128xf32>
    %48 = vector.extract_strided_slice %2 {offsets = [7, 0], sizes = [1, 128], strides = [1, 1]} : vector<11x128xf32> to vector<1x128xf32>
    %49 = vector.broadcast %48 : vector<1x128xf32> to vector<16x128xf32>
    %50 = arith.mulf %49, %11 : vector<16x128xf32>
    %51 = math.tanh %50 : vector<16x128xf32>
    %52 = vector.extract_strided_slice %2 {offsets = [8, 0], sizes = [1, 128], strides = [1, 1]} : vector<11x128xf32> to vector<1x128xf32>
    %53 = vector.broadcast %52 : vector<1x128xf32> to vector<16x128xf32>
    %54 = arith.mulf %53, %11 : vector<16x128xf32>
    %55 = math.tanh %54 : vector<16x128xf32>
    %56 = vector.broadcast %9 : vector<1x128xf32> to vector<16x128xf32>
    %57 = arith.mulf %8, %56 : vector<16x128xf32>
    %cst_22 = arith.constant 1.000000e+00 : f32
    %58 = vector.broadcast %cst_22 : f32 to vector<1x128xf32>
    %59 = arith.subf %58, %9 : vector<1x128xf32>
    %60 = arith.mulf %40, %51 : vector<16x128xf32>
    %61 = math.exp %60 : vector<16x128xf32>
    %62 = arith.mulf %8, %61 : vector<16x128xf32>
    %63 = arith.mulf %47, %55 : vector<16x128xf32>
    %64 = arith.addf %62, %63 : vector<16x128xf32>
    %65 = vector.broadcast %59 : vector<1x128xf32> to vector<16x128xf32>
    %66 = arith.mulf %65, %64 : vector<16x128xf32>
    %67 = arith.addf %57, %66 : vector<16x128xf32>
    %cst_23 = arith.constant 0.000000e+00 : f32
    %68 = vector.broadcast %cst_23 : f32 to vector<16x128xf32>
    %69 = arith.maximumf %67, %68 : vector<16x128xf32>
    %c4 = arith.constant 4 : index
    %c0_24 = arith.constant 0 : index
    %c0_25 = arith.constant 0 : index
    %70 = vector.load %arg5[%c4, %c0_24, %c0_25] : memref<5x128x128xbf16, #tpu.memory_space<vmem>>, vector<1x128x128xbf16>
    %71 = vector.shape_cast %70 : vector<1x128x128xbf16> to vector<128x128xbf16>
    %72 = arith.truncf %69 : vector<16x128xf32> to vector<16x128xbf16>
    %cst_26 = arith.constant dense<0.000000e+00> : vector<16x128xf32>
    %73 = tpu.matmul %72, %71, %cst_26 {dimension_numbers = #tpu.dot_dimension_numbers<[1], [0], [0], [1], [0, 0, 1, 1], [], []>} : vector<16x128xbf16>, vector<128x128xbf16>, vector<16x128xf32> -> vector<16x128xf32>
    %74 = vector.extract_strided_slice %2 {offsets = [9, 0], sizes = [1, 128], strides = [1, 1]} : vector<11x128xf32> to vector<1x128xf32>
    %75 = vector.broadcast %74 : vector<1x128xf32> to vector<16x128xf32>
    %76 = arith.addf %73, %75 : vector<16x128xf32>
    %cst_27 = arith.constant 0.000000e+00 : f32
    %77 = vector.broadcast %cst_27 : f32 to vector<16x128xf32>
    %78 = arith.maximumf %76, %77 : vector<16x128xf32>
    %79 = arith.truncf %78 : vector<16x128xf32> to vector<16x128xbf16>
    %cst_28 = arith.constant dense<0.000000e+00> : vector<16x128xf32>
    %80 = tpu.matmul %79, %4, %cst_28 {dimension_numbers = #tpu.dot_dimension_numbers<[1], [0], [0], [1], [0, 0, 1, 1], [], []>} : vector<16x128xbf16>, vector<128x128xbf16>, vector<16x128xf32> -> vector<16x128xf32>
    %81 = vector.extract_strided_slice %2 {offsets = [10, 0], sizes = [1, 128], strides = [1, 1]} : vector<11x128xf32> to vector<1x128xf32>
    %82 = vector.broadcast %81 : vector<1x128xf32> to vector<16x128xf32>
    %83 = arith.addf %80, %82 : vector<16x128xf32>
    %84 = arith.truncf %83 : vector<16x128xf32> to vector<16x128xbf16>
    %c0_29 = arith.constant 0 : index
    %c0_30 = arith.constant 0 : index
    %85 = vector.load %arg7[%c0_29, %c0_30] : memref<16x128xbf16, #tpu.memory_space<vmem>>, vector<16x128xbf16>
    tpu.vector_store %arg7[%c0_29, %c0_30], %84 {strides = array<i32>} : memref<16x128xbf16, #tpu.memory_space<vmem>>, vector<16x128xbf16>,
    %86 = arith.truncf %78 : vector<16x128xf32> to vector<16x128xbf16>
    %c0_31 = arith.constant 0 : index
    %c0_32 = arith.constant 0 : index
    %87 = vector.load %arg8[%c0_31, %c0_32] : memref<16x128xbf16, #tpu.memory_space<vmem>>, vector<16x128xbf16>
    tpu.vector_store %arg8[%c0_31, %c0_32], %86 {strides = array<i32>} : memref<16x128xbf16, #tpu.memory_space<vmem>>, vector<16x128xbf16>,
    return
  }
  func.func @transform_0(%arg0: i32) -> (i32, i32) {
    %c0_i32 = arith.constant 0 : i32
    %c0_i32_0 = arith.constant 0 : i32
    return %arg0, %c0_i32 : i32, i32
  }
  func.func @transform_1(%arg0: i32) -> (i32, i32) {
    %c0_i32 = arith.constant 0 : i32
    %c0_i32_0 = arith.constant 0 : i32
    return %arg0, %c0_i32 : i32, i32
  }
  func.func @transform_2(%arg0: i32) -> (i32, i32) {
    %c0_i32 = arith.constant 0 : i32
    %c0_i32_0 = arith.constant 0 : i32
    %c0_i32_1 = arith.constant 0 : i32
    return %c0_i32, %c0_i32_0 : i32, i32
  }
  func.func @transform_3(%arg0: i32) -> (i32, i32) {
    %c0_i32 = arith.constant 0 : i32
    %c0_i32_0 = arith.constant 0 : i32
    %c0_i32_1 = arith.constant 0 : i32
    return %c0_i32, %c0_i32_0 : i32, i32
  }
  func.func @transform_4(%arg0: i32) -> (i32, i32, i32) {
    %c0_i32 = arith.constant 0 : i32
    %c0_i32_0 = arith.constant 0 : i32
    %c0_i32_1 = arith.constant 0 : i32
    %c0_i32_2 = arith.constant 0 : i32
    return %c0_i32, %c0_i32_0, %c0_i32_1 : i32, i32, i32
  }
  func.func @transform_5(%arg0: i32) -> (i32, i32) {
    %c0_i32 = arith.constant 0 : i32
    %c0_i32_0 = arith.constant 0 : i32
    %c0_i32_1 = arith.constant 0 : i32
    return %c0_i32, %c0_i32_0 : i32, i32
  }
  func.func @transform_6(%arg0: i32) -> (i32, i32) {
    %c0_i32 = arith.constant 0 : i32
    %c0_i32_0 = arith.constant 0 : i32
    return %arg0, %c0_i32 : i32, i32
  }
  func.func @transform_7(%arg0: i32) -> (i32, i32) {
    %c0_i32 = arith.constant 0 : i32
    %c0_i32_0 = arith.constant 0 : i32
    return %arg0, %c0_i32 : i32, i32
  }
}

</mosaic_0001>

<bundles_post_ra>
// kernel: tpu_custom_call.1
= control target key start
LH: loop header
LB: loop body
LE: loop exit
PB: predicated region body
PF: predicated region fallthrough
CT: control target
= control target key end

     0   :  { %13 = vsyncpa [#allocation3], 0  ;;  %s1305_s0 = inlined_call_operand.hbm [shape: bf16[16,10], index: 0, kind: input, shape index: {}]   ;;  %s1306_s1 = inlined_call_operand.vmem [shape: f32[16,1], index: 1, kind: input, shape index: {}]   ;;  %s1307_s2 = inlined_call_operand.vmem [shape: f32[11,128], index: 2, kind: input, shape index: {}]   ;;  %s1308_s3 = inlined_call_operand.hbm [shape: bf16[10,128], index: 3, kind: input, shape index: {}]   ;;  %s1309_s4 = inlined_call_operand.hbm [shape: bf16[5,128,128], index: 4, kind: input, shape index: {}]   ;;  %s1310_s5 = inlined_call_operand.hbm [shape: bf16[128,128], index: 5, kind: input, shape index: {}]   ;;  %s1311_s6 = inlined_call_operand.hbm [shape: bf16[16,128], index: 6, kind: output, shape index: {0}]   ;;  %s1312_s7 = inlined_call_operand.hbm [shape: bf16[16,128], index: 7, kind: output, shape index: {1}]  }
   0x1   :  { %14 = vsyncpa [#allocation6], 0 }
   0x2   :  { %15 = vsyncpa [#allocation9], 0 }
   0x3   :  { %16 = vsyncpa [#allocation4], 0 }
   0x4   :  { %17 = vsyncpa [#allocation12], 0  ;;  %s39_s26 = sshll.u32 %s1308_s3, 4  ;;  %s1166_s27 = smov [#allocation5]   ;;  %s40_s26 = int_to_ptr.hbm [resolvable:$true] %s39_s26 }
   0x5   :  { %s41_s28 = sshll.u32 %s1166_s27, 4  ;;  %s22_s8 = sshll.u32 %s1305_s0, 4  ;;  %s42_s28 = int_to_ptr.vmem [resolvable:$true] %s41_s28  ;;  %s23_s8 = int_to_ptr.hbm [resolvable:$true] %s22_s8 }
   0x6   :  { %s1167_s9 = smov 64   ;;  %s1168_s10 = smov 4  }
   0x7   :  { %47 = dma.hbm_to_vmem [thread:$0]  %s40_s26, 128, %s42_s28, [#allocation6], %s1167_s9, %s1167_s9, %s1168_s10  }
   0x8   :  { %s1169_s11 = smov [#allocation2]   ;;  %s52_s3 = sshll.u32 %s1309_s4, 4  ;;  %s53_s3 = int_to_ptr.hbm [resolvable:$true] %s52_s3 }
   0x9   :  { %s24_s12 = sshll.u32 %s1169_s11, 4  ;;  %s65_s16 = sshll.u32 %s1310_s5, 4  ;;  %s25_s12 = int_to_ptr.vmem [resolvable:$true] %s24_s12  ;;  %s66_s16 = int_to_ptr.hbm [resolvable:$true] %s65_s16 }
   0xa   :  { %30 = dma.hbm_to_vmem [thread:$0]  %s23_s8, 128, %s25_s12, [#allocation3], %s1167_s9, %s1167_s9, %s1168_s10  }
   0xb   :  { %s1170_s17 = smov [#allocation7]   ;;  %s1171_s19 = smov [#allocation8]  }
   0xc   :  { %s54_s18 = sshll.u32 %s1170_s17, 4  ;;  %s67_s4 = sshll.u32 %s1171_s19, 4  ;;  %s55_s18 = int_to_ptr.vmem [resolvable:$true] %s54_s18  ;;  %s68_s4 = int_to_ptr.vmem [resolvable:$true] %s67_s4 }
   0xd   :  { %60 = dma.hbm_to_vmem [thread:$0]  %s53_s3, 5120, %s55_s18, [#allocation6], %s1167_s9, %s1167_s9, %s1168_s10  }
   0xe   :  { %73 = dma.hbm_to_vmem [thread:$0]  %s66_s16, 1024, %s68_s4, [#allocation9], %s1167_s9, %s1167_s9, %s1168_s10  }
   0xf   :  { %1156 = dma.done.wait [#allocation3], 128  }
  0x10   :  { %1157 = vsyncadd [#allocation3], 4294967168 }
  0x11   :  { %1158 = dma.done.wait [#allocation6], 5248  }
  0x12   :  { %1159 = vsyncadd [#allocation6], 4294962048 }
  0x13   :  { %1160 = dma.done.wait [#allocation9], 1024  }
  0x14   :  { %1161 = vsyncadd [#allocation9], 4294966272  ;;  %v727_v0 = vld [vmem:[#allocation5] sm:$0xf]  ;;  %v923_v1 = vld [vmem:[#allocation5] sm:$0x10] }
  0x15   :  { %vm130_vm0 = vcmask 1044480   ;;  %v728_v2 = vor.u32 %v923_v1, %v727_v0  ;;  %v939_v3 = vld [vmem:[#allocation7 + $0x38] sm:$0xff]  ;;  %v922_v5 = vld [vmem:[#allocation2] sm:$0xff]  ;;  %vm126_vm1 = vcmask 80896   ;;  %v937_v7 = vld [vmem:[#allocation7 + $0x28] sm:$0xff]  ;;  %v1172_v13 = vmov 0  }
  0x16   :  { %229 = vmatpush.bf16.msra.mxu1 %v939_v3  ;;  %v938_v6 = vld [vmem:[#allocation7 + $0x30] sm:$0xff]  ;;  %v936_v8 = vld [vmem:[#allocation7 + $0x20] sm:$0xff]  ;;  %v935_v9 = vld [vmem:[#allocation7 + $0x18] sm:$0xff]  ;;  %991 = vset.pattern.permute.xlu0 %v1172_v13  ;;  %s701_s29 = sshll.u32 %s1312_s7, 4  ;;  %s1174_s30 = smov [#allocation10]   ;;  %s702_s29 = int_to_ptr.hbm [resolvable:$true] %s701_s29 }
  0x17   :  { %v132_v4 = vsel %vm130_vm0, %v728_v2, 0  ;;  %v934_v10 = vld [vmem:[#allocation7 + $0x10] sm:$0xff]  ;;  %v933_v11 = vld [vmem:[#allocation7 + $0x8] sm:$0xff]  ;;  %v932_v12 = vld [vmem:[#allocation7] sm:$0xff]  ;;  %s686_s8 = sshll.u32 %s1174_s30, 4  ;;  %s688_s13 = sshll.u32 %s1311_s6, 4  ;;  %s687_s8 = int_to_ptr.vmem [resolvable:$true] %s686_s8  ;;  %s689_s13 = int_to_ptr.hbm [resolvable:$true] %s688_s13 }
  0x18   :  { %141 = vmatpush.bf16.msra.mxu0 %v132_v4  ;;  %v93_v14 = vld [vmem:[%s1306_s1] sm:$0xff]  ;;  %v94_v15 = vld [vmem:[%s1306_s1 + $0x8] sm:$0xff]  ;;  %v945_v28 = vld [vmem:[#allocation7 + $0x68] sm:$0xff] }
  0x19   :  { %150 = vperm.xlu0 %991, %v93_v14   ;;  %v1248_v16 = vld [vmem:[%s1307_s2] sm:$0xff]  ;;  %v947_v26 = vld [vmem:[#allocation7 + $0x78] sm:$0xff]  ;;  %v944_v29 = vld [vmem:[#allocation7 + $0x60] sm:$0xff] }
  0x1a   :  { %230 = vmatpush.bf16.msra.mxu1 %v938_v6  ;;  %v115_v18 = vperm.slane %v1248_v16, 0  ;;  %v158_v20 = vperm.slane %v1248_v16, 1  ;;  %315 = vmatpush.bf16.msra.mxu2 %v947_v26  ;;  %v946_v27 = vld [vmem:[#allocation7 + $0x70] sm:$0xff]  ;;  %v943_v30 = vld [vmem:[#allocation7 + $0x58] sm:$0xff]  ;;  %v941_v32 = vld [vmem:[#allocation7 + $0x48] sm:$0xff]  ;;  %v178_v39 = vperm.slane %v1248_v16, 2 }
  0x1b   :  { %729 = vmatmul.msk.bf16.vlgmr.msra.gmra.mxu0 %vm126_vm1, %v922_v5  ;;  %v942_v31 = vld [vmem:[#allocation7 + $0x50] sm:$0xff]  ;;  %v940_v33 = vld [vmem:[#allocation7 + $0x40] sm:$0xff]  ;;  %v955_v34 = vld [vmem:[#allocation7 + $0xb8] sm:$0xff]  ;;  %v243_v46 = vperm.slane %v1248_v16, 3  ;;  %v266_v2 = vperm.slane %v1248_v16, 4  ;;  %v492_v14 = vperm.slane %v1248_v16, 7 }
  0x1c   :  { %v963_v35 = vld [vmem:[#allocation7 + $0xf8] sm:$0xff]  ;;  %398 = vmatpush.bf16.msra.mxu3 %v955_v34  ;;  %v954_v36 = vld [vmem:[#allocation7 + $0xb0] sm:$0xff]  ;;  %v953_v40 = vld [vmem:[#allocation7 + $0xa8] sm:$0xff] }
  0x1d   :  { %478 = vmatpush.bf16.msrb.mxu0 %v963_v35  ;;  %v962_v37 = vld [vmem:[#allocation7 + $0xf0] sm:$0xff]  ;;  %v961_v41 = vld [vmem:[#allocation7 + $0xe8] sm:$0xff]  ;;  %v952_v55 = vld [vmem:[#allocation7 + $0xa0] sm:$0xff] }
  0x1e   :  { %231 = vmatpush.bf16.msra.mxu1 %v937_v7  ;;  %316 = vmatpush.bf16.msra.mxu2 %v946_v27  ;;  %v960_v56 = vld [vmem:[#allocation7 + $0xe0] sm:$0xff]  ;;  %v951_v57 = vld [vmem:[#allocation7 + $0x98] sm:$0xff]  ;;  %v950_v59 = vld [vmem:[#allocation7 + $0x90] sm:$0xff] }
  0x1f   :  { %v959_v58 = vld [vmem:[#allocation7 + $0xd8] sm:$0xff]  ;;  %v958_v60 = vld [vmem:[#allocation7 + $0xd0] sm:$0xff]  ;;  %v949_v61 = vld [vmem:[#allocation7 + $0x88] sm:$0xff] }
  0x20   :  { %399 = vmatpush.bf16.msra.mxu3 %v954_v36  ;;  %v957_v62 = vld [vmem:[#allocation7 + $0xc8] sm:$0xff]  ;;  %v948_v63 = vld [vmem:[#allocation7 + $0x80] sm:$0xff]  ;;  %v967_v13 = vld [vmem:[#allocation7 + $0x118] sm:$0xff] }
  0x21   :  { %155 = vperm.xlu0 %991, %v94_v15   ;;  %479 = vmatpush.bf16.msrb.mxu0 %v962_v37  ;;  %v956_v0 = vld [vmem:[#allocation7 + $0xc0] sm:$0xff]  ;;  %v966_v15 = vld [vmem:[#allocation7 + $0x110] sm:$0xff]  ;;  %v429_v37 = vperm.slane %v1248_v16, 6 }
  0x22   :  { %232 = vmatpush.bf16.msra.mxu1 %v936_v8  ;;  %317 = vmatpush.bf16.msra.mxu2 %v945_v28 }
  0x24   :  { %400 = vmatpush.bf16.msra.mxu3 %v953_v40  ;;  %v929_v40 = vld [vmem:[#allocation8 + $0x28] sm:$0xff] }
  0x25   :  { %480 = vmatpush.bf16.msrb.mxu0 %v961_v41 }
  0x26   :  { %233 = vmatpush.bf16.msra.mxu1 %v935_v9  ;;  %318 = vmatpush.bf16.msra.mxu2 %v944_v29  ;;  %v971_v9 = vld [vmem:[#allocation7 + $0x138] sm:$0xff] }
  0x28   :  { %401 = vmatpush.bf16.msra.mxu3 %v952_v55 }
  0x29   :  { %481 = vmatpush.bf16.msrb.mxu0 %v960_v56 }
  0x2a   :  { %234 = vmatpush.bf16.msra.mxu1 %v934_v10  ;;  %319 = vmatpush.bf16.msra.mxu2 %v943_v30  ;;  %v970_v10 = vld [vmem:[#allocation7 + $0x130] sm:$0xff] }
  0x2c   :  { %402 = vmatpush.bf16.msra.mxu3 %v951_v57 }
  0x2d   :  { %482 = vmatpush.bf16.msrb.mxu0 %v959_v58 }
  0x2e   :  { %235 = vmatpush.bf16.msra.mxu1 %v933_v11  ;;  %320 = vmatpush.bf16.msra.mxu2 %v942_v31  ;;  %v969_v11 = vld [vmem:[#allocation7 + $0x128] sm:$0xff]  ;;  %v931_v31 = vld [vmem:[#allocation8 + $0x38] sm:$0xff] }
  0x30   :  { %403 = vmatpush.bf16.msra.mxu3 %v950_v59 }
  0x31   :  { %483 = vmatpush.bf16.msrb.mxu0 %v958_v60 }
  0x32   :  { %236 = vmatpush.bf16.msra.mxu1 %v932_v12  ;;  %321 = vmatpush.bf16.msra.mxu2 %v941_v32  ;;  %v968_v12 = vld [vmem:[#allocation7 + $0x120] sm:$0xff] }
  0x34   :  { %404 = vmatpush.bf16.msra.mxu3 %v949_v61 }
  0x35   :  { %484 = vmatpush.bf16.msrb.mxu0 %v957_v62 }
  0x36   :  { %322 = vmatpush.bf16.msra.mxu2 %v940_v33  ;;  %589 = vmatpush.bf16.msrb.mxu1 %v971_v9  ;;  %v930_v33 = vld [vmem:[#allocation8 + $0x30] sm:$0xff] }
  0x38   :  { %405 = vmatpush.bf16.msra.mxu3 %v948_v63 }
  0x39   :  { %485 = vmatpush.bf16.msrb.mxu0 %v956_v0 }
  0x3a   :  { %590 = vmatpush.bf16.msrb.mxu1 %v970_v10  ;;  %662 = vmatpush.bf16.msrb.mxu2 %v931_v31 }
  0x3e   :  { %591 = vmatpush.bf16.msrb.mxu1 %v969_v11  ;;  %663 = vmatpush.bf16.msrb.mxu2 %v930_v33 }
  0x42   :  { %592 = vmatpush.bf16.msrb.mxu1 %v968_v12  ;;  %664 = vmatpush.bf16.msrb.mxu2 %v929_v40 }
  0x46   :  { %593 = vmatpush.bf16.msrb.mxu1 %v967_v13 }
  0x4a   :  { %594 = vmatpush.bf16.msrb.mxu1 %v966_v15 }
  0x8b   :  { %v1264_v38 = vpop.permute.xlu0 %150 }
  0x8c   :  { %v179_v42 = vmul.f32 %v178_v39, %v1264_v38 }
  0x93   :  { %v1268_v44 = vpop.permute.xlu0 %155 }
  0x94   :  { %v180_v47 = vmul.f32 %v178_v39, %v1268_v44  ;;  %v494_v26 = vmul.f32 %v492_v14, %v1268_v44 }
  0x98   :  { %v143_v17 = vpop.f32.mrf.mxu0 }
  0x99   :  { %v1251_v19 = vadd.f32 %v143_v17, %v115_v18  ;;  %v965_v17 = vld [vmem:[#allocation7 + $0x108] sm:$0xff] }
  0x9a   :  { %595 = vmatpush.bf16.msrb.mxu1 %v965_v17 }
  0x9b   :  { %v1257_v23 = vmul.f32 %v158_v20, %v1251_v19 }
  0xa0   :  { %v145_v21 = vpop.f32.mrf.mxu0 }
  0xa1   :  { %v1254_v22 = vadd.f32 %v145_v21, %v115_v18  ;;  %v493_v18 = vmul.f32 %v492_v14, %v1264_v38  ;;  %v349_v21 = vperm.slane %v1248_v16, 5 }
  0xa3   :  { %v1260_v24 = vmul.f32 %v158_v20, %v1254_v22  ;;  %v964_v20 = vld [vmem:[#allocation7 + $0x100] sm:$0xff] }
  0xa4   :  { %596 = vmatpush.bf16.msrb.mxu1 %v964_v20 }
  0xa5   :  { %v177_v25 = vpack.c.bf16 %v1260_v24, %v1257_v23 }
  0xa7   :  { %237 = vmatmul.bf16.vlgmr.msra.gmra.mxu1 %v177_v25  ;;  %v1279_v25 = vld [vmem:[%s1307_s2 + $0x8] sm:$0x7]  ;;  %s1173_s2 = smov [#allocation11]  }
  0xa8   :  { %v497_v28 = vperm.slane %v1279_v25, 0  ;;  %s699_s26 = sshll.u32 %s1173_s2, 4  ;;  %s700_s26 = int_to_ptr.vmem [resolvable:$true] %s699_s26 }
  0xaa   :  { %v498_v34 = vmul.f32 %v497_v28, %v1264_v38 }
 0x124   :  { %v238_v43 = vpop.f32.mrf.mxu1 }
 0x125   :  { %v239_v45 = vadd.f32 %v238_v43, %v179_v42  ;;  %v499_v43 = vmul.f32 %v497_v28, %v1268_v44 }
 0x127   :  { %v244_v48 = vadd.f32 %v243_v46, %v239_v45 }
 0x129   :  { %992 = vtanh.f32 %v244_v48 }
 0x12c   :  { %v240_v49 = vpop.f32.mrf.mxu1 }
 0x12d   :  { %v241_v50 = vadd.f32 %v240_v49, %v180_v47  ;;  %v502_v49 = vsub.f32 1.0, %v1248_v16 }
 0x12f   :  { %v245_v51 = vadd.f32 %v243_v46, %v241_v50  ;;  %v993_v52 = vpop.eup %992  ;;  %v515_v55 = vperm.slane %v502_v49, 1 }
 0x131   :  { %994 = vtanh.f32 %v245_v51 }
 0x137   :  { %v995_v53 = vpop.eup %994 }
 0x138   :  { %v265_v54 = vpack.c.bf16 %v995_v53, %v993_v52 }
 0x13a   :  { %323 = vmatmul.bf16.vlgmr.msra.gmra.mxu2 %v265_v54 }
 0x1bd   :  { %v324_v1 = vpop.f32.mrf.mxu2 }
 0x1be   :  { %v325_v3 = vadd.f32 %v324_v1, %v266_v2  ;;  %v928_v1 = vld [vmem:[#allocation8 + $0x20] sm:$0xff] }
 0x1bf   :  { %665 = vmatpush.bf16.msrb.mxu2 %v928_v1 }
 0x1c0   :  { %996 = vtanh.f32 %v325_v3  ;;  %v926_v3 = vld [vmem:[#allocation8 + $0x10] sm:$0xff] }
 0x1c5   :  { %v326_v4 = vpop.f32.mrf.mxu2 }
 0x1c6   :  { %v327_v5 = vadd.f32 %v326_v4, %v266_v2  ;;  %v997_v6 = vpop.eup %996  ;;  %v927_v2 = vld [vmem:[#allocation8 + $0x18] sm:$0xff]  ;;  %v925_v4 = vld [vmem:[#allocation8 + $0x8] sm:$0xff] }
 0x1c7   :  { %666 = vmatpush.bf16.msrb.mxu2 %v927_v2 }
 0x1c8   :  { %998 = vtanh.f32 %v327_v5  ;;  %v540_v5 = vperm.slane %v1279_v25, 1 }
 0x1c9   :  { %1000 = vtanh.f32 %v493_v18  ;;  %v607_v18 = vperm.slane %v1279_v25, 2 }
 0x1ca   :  { %1002 = vtanh.f32 %v494_v26 }
 0x1cb   :  { %667 = vmatpush.bf16.msrb.mxu2 %v926_v3 }
 0x1ce   :  { %v999_v7 = vpop.eup %998 }
 0x1cf   :  { %v348_v8 = vpack.c.bf16 %v999_v7, %v997_v6  ;;  %v1001_v30 = vpop.eup %1000  ;;  %668 = vmatpush.bf16.msrb.mxu2 %v925_v4 }
 0x1d0   :  { %v1003_v42 = vpop.eup %1002 }
 0x1d1   :  { %406 = vmatmul.bf16.vlgmr.msra.gmra.mxu3 %v348_v8  ;;  %486 = vmatmul.bf16.vlgmr.msrb.gmra.mxu0 %v348_v8 }
 0x24e   :  { %v487_v35 = vpop.f32.mrf.mxu0 }
 0x24f   :  { %v488_v46 = vadd.f32 %v487_v35, %v429_v37 }
 0x254   :  { %v407_v27 = vpop.f32.mrf.mxu3 }
 0x255   :  { %v408_v29 = vadd.f32 %v407_v27, %v349_v21 }
 0x256   :  { %v489_v51 = vpop.f32.mrf.mxu0 }
 0x257   :  { %v503_v32 = vmul.f32 %v1001_v30, %v408_v29  ;;  %v490_v53 = vadd.f32 %v489_v51, %v429_v37 }
 0x259   :  { %v505_v36 = vmul.f32 1.442695, %v503_v32 }
 0x25b   :  { %1004 = vpow2.f32 %v505_v36 }
 0x25c   :  { %v409_v39 = vpop.f32.mrf.mxu3  ;;  %1006 = vtanh.f32 %v498_v34 }
 0x25d   :  { %v410_v41 = vadd.f32 %v409_v39, %v349_v21  ;;  %1008 = vtanh.f32 %v499_v43 }
 0x25f   :  { %v504_v45 = vmul.f32 %v1003_v42, %v410_v41 }
 0x261   :  { %v1005_v47 = vpop.eup %1004  ;;  %v507_v48 = vmul.f32 1.442695, %v504_v45 }
 0x262   :  { %v509_v38 = vmul.f32 %v1005_v47, %v1251_v19  ;;  %v1007_v50 = vpop.eup %1006 }
 0x263   :  { %1010 = vpow2.f32 %v507_v48  ;;  %v511_v52 = vmul.f32 %v1007_v50, %v488_v46  ;;  %v1009_v56 = vpop.eup %1008 }
 0x264   :  { %v512_v44 = vmul.f32 %v1009_v56, %v490_v53 }
 0x265   :  { %v513_v54 = vadd.f32 %v511_v52, %v509_v38 }
 0x267   :  { %v516_v59 = vmul.f32 %v515_v55, %v513_v54 }
 0x269   :  { %v1011_v57 = vpop.eup %1010  ;;  %v518_v62 = vadd.f32 %v516_v59, %v1257_v23 }
 0x26a   :  { %v510_v58 = vmul.f32 %v1011_v57, %v1254_v22  ;;  %v924_v22 = vld [vmem:[#allocation8] sm:$0xff] }
 0x26b   :  { %v520_v16 = vmax.f32 %v518_v62, 0.0  ;;  %669 = vmatpush.bf16.msrb.mxu2 %v924_v22 }
 0x26c   :  { %v514_v60 = vadd.f32 %v512_v44, %v510_v58 }
 0x26e   :  { %v517_v61 = vmul.f32 %v515_v55, %v514_v60 }
 0x270   :  { %v519_v19 = vadd.f32 %v517_v61, %v1260_v24 }
 0x272   :  { %v521_v63 = vmax.f32 %v519_v19, 0.0 }
 0x274   :  { %v539_v0 = vpack.c.bf16 %v521_v63, %v520_v16 }
 0x276   :  { %597 = vmatmul.bf16.vlgmr.msrb.gmra.mxu1 %v539_v0 }
 0x2f3   :  { %v598_v6 = vpop.f32.mrf.mxu1 }
 0x2f4   :  { %v599_v23 = vadd.f32 %v598_v6, %v540_v5 }
 0x2f6   :  { %v603_v7 = vmax.f32 %v599_v23, 0.0 }
 0x2f8   :  { %v605_v9 = vpack.c.bf16 %v603_v7, %v603_v7 }
 0x2fa   :  { %v610_v13 = vunpack.c.l.b16 %v605_v9 }
 0x2fb   :  { %v600_v24 = vpop.f32.mrf.mxu1 }
 0x2fc   :  { %v601_v8 = vadd.f32 %v600_v24, %v540_v5 }
 0x2fe   :  { %v604_v10 = vmax.f32 %v601_v8, 0.0 }
 0x300   :  { %v606_v11 = vpack.c.bf16 %v604_v10, %v604_v10  ;;  %v980_v12 = vpack.c.bf16 %v604_v10, %v603_v7 }
 0x302   :  { %v611_v14 = vunpack.c.l.b16 %v606_v11  ;;  %981 = vst [vmem:[#allocation11] sm:$0xff] %v980_v12  }
 0x303   :  { %707 = dma.vmem_to_hbm [thread:$0]  %s700_s26, 128, %s702_s29, [#allocation12], %s1167_s9, %s1167_s9, %s1168_s10  }
 0x304   :  { %v612_v15 = vpack.c.b16 %v611_v14, %v610_v13 }
 0x306   :  { %670 = vmatmul.bf16.vlgmr.msrb.gmra.mxu2 %v612_v15 }
 0x389   :  { %v671_v17 = vpop.f32.mrf.mxu2 }
 0x38a   :  { %v672_v21 = vadd.f32 %v671_v17, %v607_v18 }
 0x391   :  { %v673_v20 = vpop.f32.mrf.mxu2 }
 0x392   :  { %v674_v26 = vadd.f32 %v673_v20, %v607_v18 }
 0x394   :  { %v975_v27 = vpack.c.bf16 %v674_v26, %v672_v21 }
 0x396   :  { %976 = vst [vmem:[#allocation10] sm:$0xff] %v975_v27  }
 0x397   :  { %694 = dma.vmem_to_hbm [thread:$0]  %s687_s8, 128, %s689_s13, [#allocation4], %s1167_s9, %s1167_s9, %s1168_s10  }
 0x398   :  { %1162 = dma.done.wait [#allocation4], 128  }
 0x399   :  { %1163 = vsyncadd [#allocation4], 4294967168 }
 0x39a   :  { %1164 = dma.done.wait [#allocation12], 128  }
 0x39b   :  { %1165 = vsyncadd [#allocation12], 4294967168 }
 0x39c   :  { %716 = vsyncpa [#allocation3], 1 }
 0x39d   :  { %717 = vsyncpa [#allocation6], 1 }
 0x39e   :  { %718 = vsyncpa [#allocation9], 1 }
 0x39f   :  { %719 = vsyncpa [#allocation4], 1 }
 0x3a0   :  { %720 = vsyncpa [#allocation12], 1 }

// kernel: tpu_custom_call.1
= control target key start
LH: loop header
LB: loop body
LE: loop exit
PB: predicated region body
PF: predicated region fallthrough
CT: control target
= control target key end

     0   :  { %13 = vsyncpa [#allocation3], 0  ;;  %s1305_s0 = inlined_call_operand.hbm [shape: bf16[16,10], index: 0, kind: input, shape index: {}]   ;;  %s1306_s1 = inlined_call_operand.vmem [shape: f32[16,1], index: 1, kind: input, shape index: {}]   ;;  %s1307_s2 = inlined_call_operand.vmem [shape: f32[11,128], index: 2, kind: input, shape index: {}]   ;;  %s1308_s3 = inlined_call_operand.hbm [shape: bf16[10,128], index: 3, kind: input, shape index: {}]   ;;  %s1309_s4 = inlined_call_operand.hbm [shape: bf16[5,128,128], index: 4, kind: input, shape index: {}]   ;;  %s1310_s5 = inlined_call_operand.hbm [shape: bf16[128,128], index: 5, kind: input, shape index: {}]   ;;  %s1311_s6 = inlined_call_operand.hbm [shape: bf16[16,128], index: 6, kind: output, shape index: {0}]   ;;  %s1312_s7 = inlined_call_operand.hbm [shape: bf16[16,128], index: 7, kind: output, shape index: {1}]  }
   0x1   :  { %14 = vsyncpa [#allocation6], 0 }
   0x2   :  { %15 = vsyncpa [#allocation9], 0 }
   0x3   :  { %16 = vsyncpa [#allocation4], 0 }
   0x4   :  { %17 = vsyncpa [#allocation12], 0  ;;  %s39_s26 = sshll.u32 %s1308_s3, 4  ;;  %s1166_s27 = smov [#allocation5]   ;;  %s40_s26 = int_to_ptr.hbm [resolvable:$true] %s39_s26 }
   0x5   :  { %s41_s28 = sshll.u32 %s1166_s27, 4  ;;  %s22_s8 = sshll.u32 %s1305_s0, 4  ;;  %s42_s28 = int_to_ptr.vmem [resolvable:$true] %s41_s28  ;;  %s23_s8 = int_to_ptr.hbm [resolvable:$true] %s22_s8 }
   0x6   :  { %s1167_s9 = smov 64   ;;  %s1168_s10 = smov 4  }
   0x7   :  { %47 = dma.hbm_to_vmem [thread:$0]  %s40_s26, 128, %s42_s28, [#allocation6], %s1167_s9, %s1167_s9, %s1168_s10  }
   0x8   :  { %s1169_s11 = smov [#allocation2]   ;;  %s52_s3 = sshll.u32 %s1309_s4, 4  ;;  %s53_s3 = int_to_ptr.hbm [resolvable:$true] %s52_s3 }
   0x9   :  { %s24_s12 = sshll.u32 %s1169_s11, 4  ;;  %s65_s16 = sshll.u32 %s1310_s5, 4  ;;  %s25_s12 = int_to_ptr.vmem [resolvable:$true] %s24_s12  ;;  %s66_s16 = int_to_ptr.hbm [resolvable:$true] %s65_s16 }
   0xa   :  { %30 = dma.hbm_to_vmem [thread:$0]  %s23_s8, 128, %s25_s12, [#allocation3], %s1167_s9, %s1167_s9, %s1168_s10  }
   0xb   :  { %s1170_s17 = smov [#allocation7]   ;;  %s1171_s19 = smov [#allocation8]  }
   0xc   :  { %s54_s18 = sshll.u32 %s1170_s17, 4  ;;  %s67_s4 = sshll.u32 %s1171_s19, 4  ;;  %s55_s18 = int_to_ptr.vmem [resolvable:$true] %s54_s18  ;;  %s68_s4 = int_to_ptr.vmem [resolvable:$true] %s67_s4 }
   0xd   :  { %60 = dma.hbm_to_vmem [thread:$0]  %s53_s3, 5120, %s55_s18, [#allocation6], %s1167_s9, %s1167_s9, %s1168_s10  }
   0xe   :  { %73 = dma.hbm_to_vmem [thread:$0]  %s66_s16, 1024, %s68_s4, [#allocation9], %s1167_s9, %s1167_s9, %s1168_s10  }
   0xf   :  { %1156 = dma.done.wait [#allocation3], 128  }
  0x10   :  { %1157 = vsyncadd [#allocation3], 4294967168 }
  0x11   :  { %1158 = dma.done.wait [#allocation6], 5248  }
  0x12   :  { %1159 = vsyncadd [#allocation6], 4294962048 }
  0x13   :  { %1160 = dma.done.wait [#allocation9], 1024  }
  0x14   :  { %1161 = vsyncadd [#allocation9], 4294966272  ;;  %v727_v0 = vld [vmem:[#allocation5] sm:$0xf]  ;;  %v923_v1 = vld [vmem:[#allocation5] sm:$0x10] }
  0x15   :  { %vm130_vm0 = vcmask 1044480   ;;  %v728_v2 = vor.u32 %v923_v1, %v727_v0  ;;  %v939_v3 = vld [vmem:[#allocation7 + $0x38] sm:$0xff]  ;;  %v922_v5 = vld [vmem:[#allocation2] sm:$0xff]  ;;  %vm126_vm1 = vcmask 80896   ;;  %v937_v7 = vld [vmem:[#allocation7 + $0x28] sm:$0xff]  ;;  %v1172_v13 = vmov 0  }
  0x16   :  { %229 = vmatpush.bf16.msra.mxu1 %v939_v3  ;;  %v938_v6 = vld [vmem:[#allocation7 + $0x30] sm:$0xff]  ;;  %v936_v8 = vld [vmem:[#allocation7 + $0x20] sm:$0xff]  ;;  %v935_v9 = vld [vmem:[#allocation7 + $0x18] sm:$0xff]  ;;  %991 = vset.pattern.permute.xlu0 %v1172_v13  ;;  %s701_s29 = sshll.u32 %s1312_s7, 4  ;;  %s1174_s30 = smov [#allocation10]   ;;  %s702_s29 = int_to_ptr.hbm [resolvable:$true] %s701_s29 }
  0x17   :  { %v132_v4 = vsel %vm130_vm0, %v728_v2, 0  ;;  %v934_v10 = vld [vmem:[#allocation7 + $0x10] sm:$0xff]  ;;  %v933_v11 = vld [vmem:[#allocation7 + $0x8] sm:$0xff]  ;;  %v932_v12 = vld [vmem:[#allocation7] sm:$0xff]  ;;  %s686_s8 = sshll.u32 %s1174_s30, 4  ;;  %s688_s13 = sshll.u32 %s1311_s6, 4  ;;  %s687_s8 = int_to_ptr.vmem [resolvable:$true] %s686_s8  ;;  %s689_s13 = int_to_ptr.hbm [resolvable:$true] %s688_s13 }
  0x18   :  { %141 = vmatpush.bf16.msra.mxu0 %v132_v4  ;;  %v93_v14 = vld [vmem:[%s1306_s1] sm:$0xff]  ;;  %v94_v15 = vld [vmem:[%s1306_s1 + $0x8] sm:$0xff]  ;;  %v945_v28 = vld [vmem:[#allocation7 + $0x68] sm:$0xff] }
  0x19   :  { %150 = vperm.xlu0 %991, %v93_v14   ;;  %v1248_v16 = vld [vmem:[%s1307_s2] sm:$0xff]  ;;  %v947_v26 = vld [vmem:[#allocation7 + $0x78] sm:$0xff]  ;;  %v944_v29 = vld [vmem:[#allocation7 + $0x60] sm:$0xff] }
  0x1a   :  { %230 = vmatpush.bf16.msra.mxu1 %v938_v6  ;;  %v115_v18 = vperm.slane %v1248_v16, 0  ;;  %v158_v20 = vperm.slane %v1248_v16, 1  ;;  %315 = vmatpush.bf16.msra.mxu2 %v947_v26  ;;  %v946_v27 = vld [vmem:[#allocation7 + $0x70] sm:$0xff]  ;;  %v943_v30 = vld [vmem:[#allocation7 + $0x58] sm:$0xff]  ;;  %v941_v32 = vld [vmem:[#allocation7 + $0x48] sm:$0xff]  ;;  %v178_v39 = vperm.slane %v1248_v16, 2 }
  0x1b   :  { %729 = vmatmul.msk.bf16.vlgmr.msra.gmra.mxu0 %vm126_vm1, %v922_v5  ;;  %v942_v31 = vld [vmem:[#allocation7 + $0x50] sm:$0xff]  ;;  %v940_v33 = vld [vmem:[#allocation7 + $0x40] sm:$0xff]  ;;  %v955_v34 = vld [vmem:[#allocation7 + $0xb8] sm:$0xff]  ;;  %v243_v46 = vperm.slane %v1248_v16, 3  ;;  %v266_v2 = vperm.slane %v1248_v16, 4  ;;  %v492_v14 = vperm.slane %v1248_v16, 7 }
  0x1c   :  { %v963_v35 = vld [vmem:[#allocation7 + $0xf8] sm:$0xff]  ;;  %398 = vmatpush.bf16.msra.mxu3 %v955_v34  ;;  %v954_v36 = vld [vmem:[#allocation7 + $0xb0] sm:$0xff]  ;;  %v953_v40 = vld [vmem:[#allocation7 + $0xa8] sm:$0xff] }
  0x1d   :  { %478 = vmatpush.bf16.msrb.mxu0 %v963_v35  ;;  %v962_v37 = vld [vmem:[#allocation7 + $0xf0] sm:$0xff]  ;;  %v961_v41 = vld [vmem:[#allocation7 + $0xe8] sm:$0xff]  ;;  %v952_v55 = vld [vmem:[#allocation7 + $0xa0] sm:$0xff] }
  0x1e   :  { %231 = vmatpush.bf16.msra.mxu1 %v937_v7  ;;  %316 = vmatpush.bf16.msra.mxu2 %v946_v27  ;;  %v960_v56 = vld [vmem:[#allocation7 + $0xe0] sm:$0xff]  ;;  %v951_v57 = vld [vmem:[#allocation7 + $0x98] sm:$0xff]  ;;  %v950_v59 = vld [vmem:[#allocation7 + $0x90] sm:$0xff] }
  0x1f   :  { %v959_v58 = vld [vmem:[#allocation7 + $0xd8] sm:$0xff]  ;;  %v958_v60 = vld [vmem:[#allocation7 + $0xd0] sm:$0xff]  ;;  %v949_v61 = vld [vmem:[#allocation7 + $0x88] sm:$0xff] }
  0x20   :  { %399 = vmatpush.bf16.msra.mxu3 %v954_v36  ;;  %v957_v62 = vld [vmem:[#allocation7 + $0xc8] sm:$0xff]  ;;  %v948_v63 = vld [vmem:[#allocation7 + $0x80] sm:$0xff]  ;;  %v967_v13 = vld [vmem:[#allocation7 + $0x118] sm:$0xff] }
  0x21   :  { %155 = vperm.xlu0 %991, %v94_v15   ;;  %479 = vmatpush.bf16.msrb.mxu0 %v962_v37  ;;  %v956_v0 = vld [vmem:[#allocation7 + $0xc0] sm:$0xff]  ;;  %v966_v15 = vld [vmem:[#allocation7 + $0x110] sm:$0xff]  ;;  %v429_v37 = vperm.slane %v1248_v16, 6 }
  0x22   :  { %232 = vmatpush.bf16.msra.mxu1 %v936_v8  ;;  %317 = vmatpush.bf16.msra.mxu2 %v945_v28 }
  0x24   :  { %400 = vmatpush.bf16.msra.mxu3 %v953_v40  ;;  %v929_v40 = vld [vmem:[#allocation8 + $0x28] sm:$0xff] }
  0x25   :  { %480 = vmatpush.bf16.msrb.mxu0 %v961_v41 }
  0x26   :  { %233 = vmatpush.bf16.msra.mxu1 %v935_v9  ;;  %318 = vmatpush.bf16.msra.mxu2 %v944_v29  ;;  %v971_v9 = vld [vmem:[#allocation7 + $0x138] sm:$0xff] }
  0x28   :  { %401 = vmatpush.bf16.msra.mxu3 %v952_v55 }
  0x29   :  { %481 = vmatpush.bf16.msrb.mxu0 %v960_v56 }
  0x2a   :  { %234 = vmatpush.bf16.msra.mxu1 %v934_v10  ;;  %319 = vmatpush.bf16.msra.mxu2 %v943_v30  ;;  %v970_v10 = vld [vmem:[#allocation7 + $0x130] sm:$0xff] }
  0x2c   :  { %402 = vmatpush.bf16.msra.mxu3 %v951_v57 }
  0x2d   :  { %482 = vmatpush.bf16.msrb.mxu0 %v959_v58 }
  0x2e   :  { %235 = vmatpush.bf16.msra.mxu1 %v933_v11  ;;  %320 = vmatpush.bf16.msra.mxu2 %v942_v31  ;;  %v969_v11 = vld [vmem:[#allocation7 + $0x128] sm:$0xff]  ;;  %v931_v31 = vld [vmem:[#allocation8 + $0x38] sm:$0xff] }
  0x30   :  { %403 = vmatpush.bf16.msra.mxu3 %v950_v59 }
  0x31   :  { %483 = vmatpush.bf16.msrb.mxu0 %v958_v60 }
  0x32   :  { %236 = vmatpush.bf16.msra.mxu1 %v932_v12  ;;  %321 = vmatpush.bf16.msra.mxu2 %v941_v32  ;;  %v968_v12 = vld [vmem:[#allocation7 + $0x120] sm:$0xff] }
  0x34   :  { %404 = vmatpush.bf16.msra.mxu3 %v949_v61 }
  0x35   :  { %484 = vmatpush.bf16.msrb.mxu0 %v957_v62 }
  0x36   :  { %322 = vmatpush.bf16.msra.mxu2 %v940_v33  ;;  %589 = vmatpush.bf16.msrb.mxu1 %v971_v9  ;;  %v930_v33 = vld [vmem:[#allocation8 + $0x30] sm:$0xff] }
  0x38   :  { %405 = vmatpush.bf16.msra.mxu3 %v948_v63 }
  0x39   :  { %485 = vmatpush.bf16.msrb.mxu0 %v956_v0 }
  0x3a   :  { %590 = vmatpush.bf16.msrb.mxu1 %v970_v10  ;;  %662 = vmatpush.bf16.msrb.mxu2 %v931_v31 }
  0x3e   :  { %591 = vmatpush.bf16.msrb.mxu1 %v969_v11  ;;  %663 = vmatpush.bf16.msrb.mxu2 %v930_v33 }
  0x42   :  { %592 = vmatpush.bf16.msrb.mxu1 %v968_v12  ;;  %664 = vmatpush.bf16.msrb.mxu2 %v929_v40 }
  0x46   :  { %593 = vmatpush.bf16.msrb.mxu1 %v967_v13 }
  0x4a   :  { %594 = vmatpush.bf16.msrb.mxu1 %v966_v15 }
  0x8b   :  { %v1264_v38 = vpop.permute.xlu0 %150 }
  0x8c   :  { %v179_v42 = vmul.f32 %v178_v39, %v1264_v38 }
  0x93   :  { %v1268_v44 = vpop.permute.xlu0 %155 }
  0x94   :  { %v180_v47 = vmul.f32 %v178_v39, %v1268_v44  ;;  %v494_v26 = vmul.f32 %v492_v14, %v1268_v44 }
  0x98   :  { %v143_v17 = vpop.f32.mrf.mxu0 }
  0x99   :  { %v1251_v19 = vadd.f32 %v143_v17, %v115_v18  ;;  %v965_v17 = vld [vmem:[#allocation7 + $0x108] sm:$0xff] }
  0x9a   :  { %595 = vmatpush.bf16.msrb.mxu1 %v965_v17 }
  0x9b   :  { %v1257_v23 = vmul.f32 %v158_v20, %v1251_v19 }
  0xa0   :  { %v145_v21 = vpop.f32.mrf.mxu0 }
  0xa1   :  { %v1254_v22 = vadd.f32 %v145_v21, %v115_v18  ;;  %v493_v18 = vmul.f32 %v492_v14, %v1264_v38  ;;  %v349_v21 = vperm.slane %v1248_v16, 5 }
  0xa3   :  { %v1260_v24 = vmul.f32 %v158_v20, %v1254_v22  ;;  %v964_v20 = vld [vmem:[#allocation7 + $0x100] sm:$0xff] }
  0xa4   :  { %596 = vmatpush.bf16.msrb.mxu1 %v964_v20 }
  0xa5   :  { %v177_v25 = vpack.c.bf16 %v1260_v24, %v1257_v23 }
  0xa7   :  { %237 = vmatmul.bf16.vlgmr.msra.gmra.mxu1 %v177_v25  ;;  %v1279_v25 = vld [vmem:[%s1307_s2 + $0x8] sm:$0x7]  ;;  %s1173_s2 = smov [#allocation11]  }
  0xa8   :  { %v497_v28 = vperm.slane %v1279_v25, 0  ;;  %s699_s26 = sshll.u32 %s1173_s2, 4  ;;  %s700_s26 = int_to_ptr.vmem [resolvable:$true] %s699_s26 }
  0xaa   :  { %v498_v34 = vmul.f32 %v497_v28, %v1264_v38 }
 0x124   :  { %v238_v43 = vpop.f32.mrf.mxu1 }
 0x125   :  { %v239_v45 = vadd.f32 %v238_v43, %v179_v42  ;;  %v499_v43 = vmul.f32 %v497_v28, %v1268_v44 }
 0x127   :  { %v244_v48 = vadd.f32 %v243_v46, %v239_v45 }
 0x129   :  { %992 = vtanh.f32 %v244_v48 }
 0x12c   :  { %v240_v49 = vpop.f32.mrf.mxu1 }
 0x12d   :  { %v241_v50 = vadd.f32 %v240_v49, %v180_v47  ;;  %v502_v49 = vsub.f32 1.0, %v1248_v16 }
 0x12f   :  { %v245_v51 = vadd.f32 %v243_v46, %v241_v50  ;;  %v993_v52 = vpop.eup %992  ;;  %v515_v55 = vperm.slane %v502_v49, 1 }
 0x131   :  { %994 = vtanh.f32 %v245_v51 }
 0x137   :  { %v995_v53 = vpop.eup %994 }
 0x138   :  { %v265_v54 = vpack.c.bf16 %v995_v53, %v993_v52 }
 0x13a   :  { %323 = vmatmul.bf16.vlgmr.msra.gmra.mxu2 %v265_v54 }
 0x1bd   :  { %v324_v1 = vpop.f32.mrf.mxu2 }
 0x1be   :  { %v325_v3 = vadd.f32 %v324_v1, %v266_v2  ;;  %v928_v1 = vld [vmem:[#allocation8 + $0x20] sm:$0xff] }
 0x1bf   :  { %665 = vmatpush.bf16.msrb.mxu2 %v928_v1 }
 0x1c0   :  { %996 = vtanh.f32 %v325_v3  ;;  %v926_v3 = vld [vmem:[#allocation8 + $0x10] sm:$0xff] }
 0x1c5   :  { %v326_v4 = vpop.f32.mrf.mxu2 }
 0x1c6   :  { %v327_v5 = vadd.f32 %v326_v4, %v266_v2  ;;  %v997_v6 = vpop.eup %996  ;;  %v927_v2 = vld [vmem:[#allocation8 + $0x18] sm:$0xff]  ;;  %v925_v4 = vld [vmem:[#allocation8 + $0x8] sm:$0xff] }
 0x1c7   :  { %666 = vmatpush.bf16.msrb.mxu2 %v927_v2 }
 0x1c8   :  { %998 = vtanh.f32 %v327_v5  ;;  %v540_v5 = vperm.slane %v1279_v25, 1 }
 0x1c9   :  { %1000 = vtanh.f32 %v493_v18  ;;  %v607_v18 = vperm.slane %v1279_v25, 2 }
 0x1ca   :  { %1002 = vtanh.f32 %v494_v26 }
 0x1cb   :  { %667 = vmatpush.bf16.msrb.mxu2 %v926_v3 }
 0x1ce   :  { %v999_v7 = vpop.eup %998 }
 0x1cf   :  { %v348_v8 = vpack.c.bf16 %v999_v7, %v997_v6  ;;  %v1001_v30 = vpop.eup %1000  ;;  %668 = vmatpush.bf16.msrb.mxu2 %v925_v4 }
 0x1d0   :  { %v1003_v42 = vpop.eup %1002 }
 0x1d1   :  { %406 = vmatmul.bf16.vlgmr.msra.gmra.mxu3 %v348_v8  ;;  %486 = vmatmul.bf16.vlgmr.msrb.gmra.mxu0 %v348_v8 }
 0x24e   :  { %v487_v35 = vpop.f32.mrf.mxu0 }
 0x24f   :  { %v488_v46 = vadd.f32 %v487_v35, %v429_v37 }
 0x254   :  { %v407_v27 = vpop.f32.mrf.mxu3 }
 0x255   :  { %v408_v29 = vadd.f32 %v407_v27, %v349_v21 }
 0x256   :  { %v489_v51 = vpop.f32.mrf.mxu0 }
 0x257   :  { %v503_v32 = vmul.f32 %v1001_v30, %v408_v29  ;;  %v490_v53 = vadd.f32 %v489_v51, %v429_v37 }
 0x259   :  { %v505_v36 = vmul.f32 1.442695, %v503_v32 }
 0x25b   :  { %1004 = vpow2.f32 %v505_v36 }
 0x25c   :  { %v409_v39 = vpop.f32.mrf.mxu3  ;;  %1006 = vtanh.f32 %v498_v34 }
 0x25d   :  { %v410_v41 = vadd.f32 %v409_v39, %v349_v21  ;;  %1008 = vtanh.f32 %v499_v43 }
 0x25f   :  { %v504_v45 = vmul.f32 %v1003_v42, %v410_v41 }
 0x261   :  { %v1005_v47 = vpop.eup %1004  ;;  %v507_v48 = vmul.f32 1.442695, %v504_v45 }
 0x262   :  { %v509_v38 = vmul.f32 %v1005_v47, %v1251_v19  ;;  %v1007_v50 = vpop.eup %1006 }
 0x263   :  { %1010 = vpow2.f32 %v507_v48  ;;  %v511_v52 = vmul.f32 %v1007_v50, %v488_v46  ;;  %v1009_v56 = vpop.eup %1008 }
 0x264   :  { %v512_v44 = vmul.f32 %v1009_v56, %v490_v53 }
 0x265   :  { %v513_v54 = vadd.f32 %v511_v52, %v509_v38 }
 0x267   :  { %v516_v59 = vmul.f32 %v515_v55, %v513_v54 }
 0x269   :  { %v1011_v57 = vpop.eup %1010  ;;  %v518_v62 = vadd.f32 %v516_v59, %v1257_v23 }
 0x26a   :  { %v510_v58 = vmul.f32 %v1011_v57, %v1254_v22  ;;  %v924_v22 = vld [vmem:[#allocation8] sm:$0xff] }
 0x26b   :  { %v520_v16 = vmax.f32 %v518_v62, 0.0  ;;  %669 = vmatpush.bf16.msrb.mxu2 %v924_v22 }
 0x26c   :  { %v514_v60 = vadd.f32 %v512_v44, %v510_v58 }
 0x26e   :  { %v517_v61 = vmul.f32 %v515_v55, %v514_v60 }
 0x270   :  { %v519_v19 = vadd.f32 %v517_v61, %v1260_v24 }
 0x272   :  { %v521_v63 = vmax.f32 %v519_v19, 0.0 }
 0x274   :  { %v539_v0 = vpack.c.bf16 %v521_v63, %v520_v16 }
 0x276   :  { %597 = vmatmul.bf16.vlgmr.msrb.gmra.mxu1 %v539_v0 }
 0x2f3   :  { %v598_v6 = vpop.f32.mrf.mxu1 }
 0x2f4   :  { %v599_v23 = vadd.f32 %v598_v6, %v540_v5 }
 0x2f6   :  { %v603_v7 = vmax.f32 %v599_v23, 0.0 }
 0x2f8   :  { %v605_v9 = vpack.c.bf16 %v603_v7, %v603_v7 }
 0x2fa   :  { %v610_v13 = vunpack.c.l.b16 %v605_v9 }
 0x2fb   :  { %v600_v24 = vpop.f32.mrf.mxu1 }
 0x2fc   :  { %v601_v8 = vadd.f32 %v600_v24, %v540_v5 }
 0x2fe   :  { %v604_v10 = vmax.f32 %v601_v8, 0.0 }
 0x300   :  { %v606_v11 = vpack.c.bf16 %v604_v10, %v604_v10  ;;  %v980_v12 = vpack.c.bf16 %v604_v10, %v603_v7 }
 0x302   :  { %v611_v14 = vunpack.c.l.b16 %v606_v11  ;;  %981 = vst [vmem:[#allocation11] sm:$0xff] %v980_v12  }
 0x303   :  { %707 = dma.vmem_to_hbm [thread:$0]  %s700_s26, 128, %s702_s29, [#allocation12], %s1167_s9, %s1167_s9, %s1168_s10  }
 0x304   :  { %v612_v15 = vpack.c.b16 %v611_v14, %v610_v13 }
 0x306   :  { %670 = vmatmul.bf16.vlgmr.msrb.gmra.mxu2 %v612_v15 }
 0x389   :  { %v671_v17 = vpop.f32.mrf.mxu2 }
 0x38a   :  { %v672_v21 = vadd.f32 %v671_v17, %v607_v18 }
 0x391   :  { %v673_v20 = vpop.f32.mrf.mxu2 }
 0x392   :  { %v674_v26 = vadd.f32 %v673_v20, %v607_v18 }
 0x394   :  { %v975_v27 = vpack.c.bf16 %v674_v26, %v672_v21 }
 0x396   :  { %976 = vst [vmem:[#allocation10] sm:$0xff] %v975_v27  }
 0x397   :  { %694 = dma.vmem_to_hbm [thread:$0]  %s687_s8, 128, %s689_s13, [#allocation4], %s1167_s9, %s1167_s9, %s1168_s10  }
 0x398   :  { %1162 = dma.done.wait [#allocation4], 128  }
 0x399   :  { %1163 = vsyncadd [#allocation4], 4294967168 }
 0x39a   :  { %1164 = dma.done.wait [#allocation12], 128  }
 0x39b   :  { %1165 = vsyncadd [#allocation12], 4294967168 }
 0x39c   :  { %716 = vsyncpa [#allocation3], 1 }
 0x39d   :  { %717 = vsyncpa [#allocation6], 1 }
 0x39e   :  { %718 = vsyncpa [#allocation9], 1 }
 0x39f   :  { %719 = vsyncpa [#allocation4], 1 }
 0x3a0   :  { %720 = vsyncpa [#allocation12], 1 }

</bundles_post_ra>
